<compile_context>
chip_gen: v6e
topology: v6e:2x2x1
jax: 0.10.0
libtpu: 0.0.40
codegen_flags: <defaults>
</compile_context>

<pallas_src>
import jax
import jax.numpy as jnp
from jax import lax
from jax.experimental import pallas as pl
from jax.experimental.pallas import tpu as pltpu


_LN_EPS = 1e-5          # PyTorch nn.LayerNorm default
_MAX_ROW_TILE = 4096    # rows per grid step (multiple of 8); raised per review


def _round_up(x, m):
    return ((x + m - 1) // m) * m


# ----------------------------- activations ---------------------------------
def _relu(x):
    return jnp.maximum(x, 0.0)


def _tanh(x):
    return jnp.tanh(x)


def _elu(x):
    return jnp.where(x > 0, x, jnp.expm1(x))


def _identity(x):
    return x


_ACTIVATIONS = {"relu": _relu, "tanh": _tanh, "elu": _elu, "identity": _identity}


def _layernorm(h, gamma, beta):
    mean = jnp.mean(h, axis=-1, keepdims=True)
    var = jnp.mean(jnp.square(h - mean), axis=-1, keepdims=True)
    return (h - mean) * lax.rsqrt(var + _LN_EPS) * gamma + beta


# ------------------------------- kernel ------------------------------------
def _make_resmlp_kernel(layer_has_proj, ln, activation, matmul_dtype):
    """Build a fused ResMLP kernel for a fixed, static layer layout.

    Ref layout: (x, w_0, w_1, ..., w_{n-1}, vec_table, out)
      * w_i     : weight matrices in order [w1, w2, (wsc)] per block, then wc.
      * vec_table: (n_vec, vec_width) f32, one padded row per 1-D param, order
                   [b1, (g1, be1), b2, (g2, be2), (bsc)] per block, then bc.
    """
    act = _ACTIVATIONS[activation]

    def kernel(*refs):
        x_ref, o_ref = refs[0], refs[-1]
        vec_ref = refs[-2]
        w_refs = refs[1:-2]

        vecs = vec_ref[...].astype(jnp.float32)   # tiny, resident
        state = {"w": 0, "v": 0}

        def take_w():
            w = w_refs[state["w"]][...]
            state["w"] += 1
            return w

        def take_v(dim):
            v = vecs[state["v"], :dim]            # static row + static lane slice
            state["v"] += 1
            return v

        def mm(a, w):
            # bf16 (or f32) operands, f32 accumulation on the MXU.
            return jnp.dot(a.astype(matmul_dtype), w.astype(matmul_dtype),
                           preferred_element_type=jnp.float32)

        h = x_ref[...].astype(jnp.float32)

        for has_proj in layer_has_proj:
            w1 = take_w()
            d = w1.shape[1]
            b1 = take_v(d)
            if ln:
                g1, be1 = take_v(d), take_v(d)
            w2 = take_w()
            b2 = take_v(d)
            if ln:
                g2, be2 = take_v(d), take_v(d)

            if has_proj:
                wsc = take_w()
                bsc = take_v(d)
                residual = mm(h, wsc) + bsc
            else:
                residual = h

            out = mm(h, w1) + b1
            if ln:
                out = _layernorm(out, g1, be1)
            out = act(out)
            out = mm(out, w2) + b2
            if ln:
                out = _layernorm(out, g2, be2)
            h = act(out + residual)

        wc = take_w()
        bc = take_v(wc.shape[1])
        y = mm(h, wc) + bc
        o_ref[...] = y.astype(o_ref.dtype)

    return kernel


# ------------------------------ wrapper -------------------------------------
def resmlp_forward(x, block_params, classifier_params, *, ln=True,
                   activation="relu", matmul_dtype=jnp.bfloat16):
    """ResMLP forward pass as a single fused Pallas TPU kernel."""
    assert x.ndim == 2, "expected (batch, input_size)"
    batch, in_dim = x.shape
    out_dim = classifier_params["w"].shape[1]

    # Lane-dense output: pad classifier columns to a multiple of 128 so the
    # final store is full-lane / unmasked; wrapper slices the padding off.
    out_w = out_dim if out_dim % 128 == 0 else _round_up(out_dim, 128)

    # ---- flatten params: weight matrices + one packed vector table ---------
    weight_mats, vec_rows, vec_dims, layer_has_proj = [], [], [], []

    def add_w(w):
        weight_mats.append(jnp.asarray(w, matmul_dtype))

    def add_v(v, dim):
        vec_rows.append(jnp.asarray(v, jnp.float32).reshape(-1))
        vec_dims.append(dim)

    for bp in block_params:
        has_proj = "wsc" in bp
        layer_has_proj.append(has_proj)
        h = bp["w1"].shape[1]
        add_w(bp["w1"]); add_v(bp["b1"], h)
        if ln:
            add_v(bp["g1"], h); add_v(bp["be1"], h)
        add_w(bp["w2"]); add_v(bp["b2"], h)
        if ln:
            add_v(bp["g2"], h); add_v(bp["be2"], h)
        if has_proj:
            add_w(bp["wsc"]); add_v(bp["bsc"], h)

    wc = jnp.asarray(classifier_params["w"], matmul_dtype)
    bc = jnp.asarray(classifier_params["b"], jnp.float32)
    if out_w != out_dim:
        wc = jnp.pad(wc, ((0, 0), (0, out_w - out_dim)))
        bc = jnp.pad(bc, (0, out_w - out_dim))
    weight_mats.append(wc)
    add_v(bc, out_w)

    vec_width = _round_up(max(vec_dims), 128)
    vec_pack = jnp.stack(
        [jnp.pad(v, (0, vec_width - v.shape[0])) for v in vec_rows], axis=0)

    # ---- row tiling: big tiles, >=2 grid steps when the batch permits ------
    # (so v7x's two TensorCores both get work); no wrapper-side padding of x —
    # the ragged final block is handled by Pallas (OOB rows masked on store).
    if batch >= 16:
        tm = min(_MAX_ROW_TILE, _round_up(pl.cdiv(batch, 2), 8))
    else:
        tm = batch
    grid = (pl.cdiv(batch, tm),)

    kernel = _make_resmlp_kernel(tuple(layer_has_proj), ln, activation,
                                 matmul_dtype)

    def build_call(single_buffer_params):
        if single_buffer_params:
            # Constant-index resident params: single-buffer (no point in
            # double-buffering a block whose index never changes).
            def pspec(p):
                return pl.BlockSpec(p.shape, lambda i: (0, 0),
                                    pipeline_mode=pl.Buffered(1))
        else:
            def pspec(p):
                return pl.BlockSpec(p.shape, lambda i: (0, 0))
        in_specs = [pl.BlockSpec((tm, in_dim), lambda i: (i, 0))]
        in_specs += [pspec(w) for w in weight_mats]
        in_specs.append(pspec(vec_pack))
        out_specs = pl.BlockSpec((tm, out_w), lambda i: (i, 0))
        return pl.pallas_call(
            kernel,
            out_shape=jax.ShapeDtypeStruct((batch, out_w), x.dtype),
            grid_spec=pltpu.PrefetchScalarGridSpec(
                num_scalar_prefetch=0,
                grid=grid,
                in_specs=in_specs,
                out_specs=out_specs,
            ),
            compiler_params=pltpu.CompilerParams(
                dimension_semantics=("parallel",),
            ),
        )

    args = (x, *weight_mats, vec_pack)
    try:
        out = build_call(True)(*args)
    except Exception:
        # Fallback if this Pallas version rejects pl.Buffered(1) on the main
        # pipeline; double-buffered params are correct, just a bit more VMEM.
        out = build_call(False)(*args)

    return out[:, :out_dim] if out_w != out_dim else out


# --------------------- parameter init (matches PyTorch) ---------------------
def _init_normc(key, in_dim, out_dim, gain, dtype=jnp.float32):
    # PyTorch init_normc_: weight (out, in) ~ N(0,1), each row scaled to norm `gain`.
    w = jax.random.normal(key, (out_dim, in_dim), dtype=jnp.float32)
    w = w * (gain / jnp.sqrt(jnp.sum(w * w, axis=1, keepdims=True)))
    return w.T.astype(dtype)  # stored (in, out) so forward is x @ W


def init_resmlp_params(key, input_size, hidden_sizes, output_size, *, gain=0.1,
                       ln=True, dtype=jnp.float32):
    block_params = []
    current = input_size
    for h in hidden_sizes:
        key, k1, k2, k3 = jax.random.split(key, 4)
        bp = {
            "w1": _init_normc(k1, current, h, gain, dtype),
            "b1": jnp.zeros((h,), dtype),
            "w2": _init_normc(k2, h, h, gain, dtype),
            "b2": jnp.zeros((h,), dtype),
        }
        if ln:
            bp.update({"g1": jnp.ones((h,), dtype), "be1": jnp.zeros((h,), dtype),
                       "g2": jnp.ones((h,), dtype), "be2": jnp.zeros((h,), dtype)})
        if current != h:
            bp["wsc"] = _init_normc(k3, current, h, gain, dtype)
            bp["bsc"] = jnp.zeros((h,), dtype)
        block_params.append(bp)
        current = h
    key, kc = jax.random.split(key)
    classifier_params = {"w": _init_normc(kc, current, output_size, gain, dtype),
                         "b": jnp.zeros((output_size,), dtype)}
    return block_params, classifier_params


# ----------------------------- pure-JAX reference ---------------------------
def resmlp_reference(x, block_params, classifier_params, *, ln=True, activation="relu"):
    act = _ACTIVATIONS[activation]

    def dot(a, b):
        return jnp.dot(a, b, precision=lax.Precision.HIGHEST)

    h = x.astype(jnp.float32)
    for bp in block_params:
        residual = dot(h, bp["wsc"]) + bp["bsc"] if "wsc" in bp else h
        out = dot(h, bp["w1"]) + bp["b1"]
        if ln:
            out = _layernorm(out, bp["g1"], bp["be1"])
        out = act(out)
        out = dot(out, bp["w2"]) + bp["b2"]
        if ln:
            out = _layernorm(out, bp["g2"], bp["be2"])
        h = act(out + residual)
    return (dot(h, classifier_params["w"]) + classifier_params["b"]).astype(x.dtype)


# ---------------------------------- main -------------------------------------
if __name__ == "__main__":
    key = jax.random.PRNGKey(0)
    input_size, hidden_sizes, output_size = 32, (32, 64), 8

    key, kp = jax.random.split(key)
    block_params, classifier_params = init_resmlp_params(
        kp, input_size, hidden_sizes, output_size, gain=0.1, ln=True)

    # --- exact-semantics check: f32 matmul operands, single-block grid -------
    key, kx = jax.random.split(key)
    x_small = jax.random.normal(kx, (8, input_size), dtype=jnp.float32)
    y = resmlp_forward(x_small, block_params, classifier_params,
                       ln=True, activation="relu", matmul_dtype=jnp.float32)
    jax.block_until_ready(y)
    y_ref = resmlp_reference(x_small, block_params, classifier_params,
                             ln=True, activation="relu")
    assert y.shape == (8, output_size) and y.dtype == x_small.dtype
    assert jnp.allclose(y, y_ref, rtol=5e-4, atol=5e-4), \
        float(jnp.max(jnp.abs(y - y_ref)))

    # --- default fast path: bf16 MXU operands, 2 grid steps, ragged last tile
    key, kx2 = jax.random.split(key)
    x_big = jax.random.normal(kx2, (24, input_size), dtype=jnp.float32)
    y2 = resmlp_forward(x_big, block_params, classifier_params,
                        ln=True, activation="relu")
    jax.block_until_ready(y2)
    y2_ref = resmlp_reference(x_big, block_params, classifier_params,
                              ln=True, activation="relu")
    assert y2.shape == (24, output_size) and y2.dtype == x_big.dtype
    assert bool(jnp.all(jnp.isfinite(y2)))
    assert jnp.allclose(y2, y2_ref, rtol=1e-1, atol=3e-2), \
        float(jnp.max(jnp.abs(y2 - y2_ref)))

    print("KERNEL_OK")
</pallas_src>

<mosaic_0001>
module attributes {stable_mosaic.version = 11 : i64} {
  func.func @kernel(%arg0: i32, %arg1: memref<8x32xf32, #tpu.memory_space<vmem>>, %arg2: memref<32x32xf32, #tpu.memory_space<vmem>>, %arg3: memref<32x32xf32, #tpu.memory_space<vmem>>, %arg4: memref<32x64xf32, #tpu.memory_space<vmem>>, %arg5: memref<64x64xf32, #tpu.memory_space<vmem>>, %arg6: memref<32x64xf32, #tpu.memory_space<vmem>>, %arg7: memref<64x128xf32, #tpu.memory_space<vmem>>, %arg8: memref<14x128xf32, #tpu.memory_space<vmem>>, %arg9: memref<8x128xf32, #tpu.memory_space<vmem>>) attributes {dimension_semantics = [#tpu.dimension_semantics<parallel>], iteration_bounds = array<i64: 1>, scalar_prefetch = 0 : i64, scratch_operands = 0 : i64, tpu.core_type = #tpu.core_type<tc>, window_params = [{transform_indices = @transform_0, window_bounds = array<i64: 8, 32>}, {pipeline_mode = #tpu.pipeline_mode<synchronous>, transform_indices = @transform_1, window_bounds = array<i64: 32, 32>}, {pipeline_mode = #tpu.pipeline_mode<synchronous>, transform_indices = @transform_2, window_bounds = array<i64: 32, 32>}, {pipeline_mode = #tpu.pipeline_mode<synchronous>, transform_indices = @transform_3, window_bounds = array<i64: 32, 64>}, {pipeline_mode = #tpu.pipeline_mode<synchronous>, transform_indices = @transform_4, window_bounds = array<i64: 64, 64>}, {pipeline_mode = #tpu.pipeline_mode<synchronous>, transform_indices = @transform_5, window_bounds = array<i64: 32, 64>}, {pipeline_mode = #tpu.pipeline_mode<synchronous>, transform_indices = @transform_6, window_bounds = array<i64: 64, 128>}, {pipeline_mode = #tpu.pipeline_mode<synchronous>, transform_indices = @transform_7, window_bounds = array<i64: 14, 128>}, {transform_indices = @transform_8, window_bounds = array<i64: 8, 128>}]} {
    %c0 = arith.constant 0 : index
    %c0_0 = arith.constant 0 : index
    %0 = vector.load %arg8[%c0, %c0_0] : memref<14x128xf32, #tpu.memory_space<vmem>>, vector<14x128xf32>
    %c0_1 = arith.constant 0 : index
    %c0_2 = arith.constant 0 : index
    %1 = vector.load %arg1[%c0_1, %c0_2] : memref<8x32xf32, #tpu.memory_space<vmem>>, vector<8x32xf32>
    %c0_3 = arith.constant 0 : index
    %c0_4 = arith.constant 0 : index
    %2 = vector.load %arg2[%c0_3, %c0_4] : memref<32x32xf32, #tpu.memory_space<vmem>>, vector<32x32xf32>
    %3 = vector.extract_strided_slice %0 {offsets = [0, 0], sizes = [1, 32], strides = [1, 1]} : vector<14x128xf32> to vector<1x32xf32>
    %4 = vector.shape_cast %3 : vector<1x32xf32> to vector<32xf32>
    %5 = vector.extract_strided_slice %0 {offsets = [1, 0], sizes = [1, 32], strides = [1, 1]} : vector<14x128xf32> to vector<1x32xf32>
    %6 = vector.shape_cast %5 : vector<1x32xf32> to vector<32xf32>
    %7 = vector.extract_strided_slice %0 {offsets = [2, 0], sizes = [1, 32], strides = [1, 1]} : vector<14x128xf32> to vector<1x32xf32>
    %8 = vector.shape_cast %7 : vector<1x32xf32> to vector<32xf32>
    %c0_5 = arith.constant 0 : index
    %c0_6 = arith.constant 0 : index
    %9 = vector.load %arg3[%c0_5, %c0_6] : memref<32x32xf32, #tpu.memory_space<vmem>>, vector<32x32xf32>
    %10 = vector.extract_strided_slice %0 {offsets = [3, 0], sizes = [1, 32], strides = [1, 1]} : vector<14x128xf32> to vector<1x32xf32>
    %11 = vector.shape_cast %10 : vector<1x32xf32> to vector<32xf32>
    %12 = vector.extract_strided_slice %0 {offsets = [4, 0], sizes = [1, 32], strides = [1, 1]} : vector<14x128xf32> to vector<1x32xf32>
    %13 = vector.shape_cast %12 : vector<1x32xf32> to vector<32xf32>
    %14 = vector.extract_strided_slice %0 {offsets = [5, 0], sizes = [1, 32], strides = [1, 1]} : vector<14x128xf32> to vector<1x32xf32>
    %15 = vector.shape_cast %14 : vector<1x32xf32> to vector<32xf32>
    %cst = arith.constant dense<0.000000e+00> : vector<8x32xf32>
    %16 = tpu.matmul %1, %2, %cst {dimension_numbers = #tpu.dot_dimension_numbers<[1], [0], [0], [1], [0, 0, 1, 1], [], []>} : vector<8x32xf32>, vector<32x32xf32>, vector<8x32xf32> -> vector<8x32xf32>
    %17 = vector.shape_cast %4 : vector<32xf32> to vector<1x32xf32>
    %18 = vector.broadcast %17 : vector<1x32xf32> to vector<8x32xf32>
    %19 = arith.addf %16, %18 : vector<8x32xf32>
    %cst_7 = arith.constant dense<0.000000e+00> : vector<8xf32>
    %20 = vector.multi_reduction <add>, %19, %cst_7 [1] : vector<8x32xf32> to vector<8xf32>
    %21 = vector.shape_cast %20 : vector<8xf32> to vector<8x1xf32>
    %cst_8 = arith.constant 3.200000e+01 : f32
    %22 = vector.broadcast %cst_8 : f32 to vector<8x1xf32>
    %23 = arith.divf %21, %22 : vector<8x1xf32>
    %24 = vector.broadcast %23 : vector<8x1xf32> to vector<8x32xf32>
    %25 = arith.subf %19, %24 : vector<8x32xf32>
    %26 = arith.mulf %25, %25 : vector<8x32xf32>
    %cst_9 = arith.constant dense<0.000000e+00> : vector<8xf32>
    %27 = vector.multi_reduction <add>, %26, %cst_9 [1] : vector<8x32xf32> to vector<8xf32>
    %28 = vector.shape_cast %27 : vector<8xf32> to vector<8x1xf32>
    %cst_10 = arith.constant 3.200000e+01 : f32
    %29 = vector.broadcast %cst_10 : f32 to vector<8x1xf32>
    %30 = arith.divf %28, %29 : vector<8x1xf32>
    %31 = vector.broadcast %23 : vector<8x1xf32> to vector<8x32xf32>
    %32 = arith.subf %19, %31 : vector<8x32xf32>
    %cst_11 = arith.constant 9.99999974E-6 : f32
    %33 = vector.broadcast %cst_11 : f32 to vector<8x1xf32>
    %34 = arith.addf %30, %33 : vector<8x1xf32>
    %35 = math.rsqrt %34 : vector<8x1xf32>
    %36 = vector.broadcast %35 : vector<8x1xf32> to vector<8x32xf32>
    %37 = arith.mulf %32, %36 : vector<8x32xf32>
    %38 = vector.shape_cast %6 : vector<32xf32> to vector<1x32xf32>
    %39 = vector.broadcast %38 : vector<1x32xf32> to vector<8x32xf32>
    %40 = arith.mulf %37, %39 : vector<8x32xf32>
    %41 = vector.shape_cast %8 : vector<32xf32> to vector<1x32xf32>
    %42 = vector.broadcast %41 : vector<1x32xf32> to vector<8x32xf32>
    %43 = arith.addf %40, %42 : vector<8x32xf32>
    %cst_12 = arith.constant 0.000000e+00 : f32
    %44 = vector.broadcast %cst_12 : f32 to vector<8x32xf32>
    %45 = arith.maximumf %43, %44 : vector<8x32xf32>
    %cst_13 = arith.constant dense<0.000000e+00> : vector<8x32xf32>
    %46 = tpu.matmul %45, %9, %cst_13 {dimension_numbers = #tpu.dot_dimension_numbers<[1], [0], [0], [1], [0, 0, 1, 1], [], []>} : vector<8x32xf32>, vector<32x32xf32>, vector<8x32xf32> -> vector<8x32xf32>
    %47 = vector.shape_cast %11 : vector<32xf32> to vector<1x32xf32>
    %48 = vector.broadcast %47 : vector<1x32xf32> to vector<8x32xf32>
    %49 = arith.addf %46, %48 : vector<8x32xf32>
    %cst_14 = arith.constant dense<0.000000e+00> : vector<8xf32>
    %50 = vector.multi_reduction <add>, %49, %cst_14 [1] : vector<8x32xf32> to vector<8xf32>
    %51 = vector.shape_cast %50 : vector<8xf32> to vector<8x1xf32>
    %cst_15 = arith.constant 3.200000e+01 : f32
    %52 = vector.broadcast %cst_15 : f32 to vector<8x1xf32>
    %53 = arith.divf %51, %52 : vector<8x1xf32>
    %54 = vector.broadcast %53 : vector<8x1xf32> to vector<8x32xf32>
    %55 = arith.subf %49, %54 : vector<8x32xf32>
    %56 = arith.mulf %55, %55 : vector<8x32xf32>
    %cst_16 = arith.constant dense<0.000000e+00> : vector<8xf32>
    %57 = vector.multi_reduction <add>, %56, %cst_16 [1] : vector<8x32xf32> to vector<8xf32>
    %58 = vector.shape_cast %57 : vector<8xf32> to vector<8x1xf32>
    %cst_17 = arith.constant 3.200000e+01 : f32
    %59 = vector.broadcast %cst_17 : f32 to vector<8x1xf32>
    %60 = arith.divf %58, %59 : vector<8x1xf32>
    %61 = vector.broadcast %53 : vector<8x1xf32> to vector<8x32xf32>
    %62 = arith.subf %49, %61 : vector<8x32xf32>
    %cst_18 = arith.constant 9.99999974E-6 : f32
    %63 = vector.broadcast %cst_18 : f32 to vector<8x1xf32>
    %64 = arith.addf %60, %63 : vector<8x1xf32>
    %65 = math.rsqrt %64 : vector<8x1xf32>
    %66 = vector.broadcast %65 : vector<8x1xf32> to vector<8x32xf32>
    %67 = arith.mulf %62, %66 : vector<8x32xf32>
    %68 = vector.shape_cast %13 : vector<32xf32> to vector<1x32xf32>
    %69 = vector.broadcast %68 : vector<1x32xf32> to vector<8x32xf32>
    %70 = arith.mulf %67, %69 : vector<8x32xf32>
    %71 = vector.shape_cast %15 : vector<32xf32> to vector<1x32xf32>
    %72 = vector.broadcast %71 : vector<1x32xf32> to vector<8x32xf32>
    %73 = arith.addf %70, %72 : vector<8x32xf32>
    %74 = arith.addf %73, %1 : vector<8x32xf32>
    %cst_19 = arith.constant 0.000000e+00 : f32
    %75 = vector.broadcast %cst_19 : f32 to vector<8x32xf32>
    %76 = arith.maximumf %74, %75 : vector<8x32xf32>
    %c0_20 = arith.constant 0 : index
    %c0_21 = arith.constant 0 : index
    %77 = vector.load %arg4[%c0_20, %c0_21] : memref<32x64xf32, #tpu.memory_space<vmem>>, vector<32x64xf32>
    %78 = vector.extract_strided_slice %0 {offsets = [6, 0], sizes = [1, 64], strides = [1, 1]} : vector<14x128xf32> to vector<1x64xf32>
    %79 = vector.shape_cast %78 : vector<1x64xf32> to vector<64xf32>
    %80 = vector.extract_strided_slice %0 {offsets = [7, 0], sizes = [1, 64], strides = [1, 1]} : vector<14x128xf32> to vector<1x64xf32>
    %81 = vector.shape_cast %80 : vector<1x64xf32> to vector<64xf32>
    %82 = vector.extract_strided_slice %0 {offsets = [8, 0], sizes = [1, 64], strides = [1, 1]} : vector<14x128xf32> to vector<1x64xf32>
    %83 = vector.shape_cast %82 : vector<1x64xf32> to vector<64xf32>
    %c0_22 = arith.constant 0 : index
    %c0_23 = arith.constant 0 : index
    %84 = vector.load %arg5[%c0_22, %c0_23] : memref<64x64xf32, #tpu.memory_space<vmem>>, vector<64x64xf32>
    %85 = vector.extract_strided_slice %0 {offsets = [9, 0], sizes = [1, 64], strides = [1, 1]} : vector<14x128xf32> to vector<1x64xf32>
    %86 = vector.shape_cast %85 : vector<1x64xf32> to vector<64xf32>
    %87 = vector.extract_strided_slice %0 {offsets = [10, 0], sizes = [1, 64], strides = [1, 1]} : vector<14x128xf32> to vector<1x64xf32>
    %88 = vector.shape_cast %87 : vector<1x64xf32> to vector<64xf32>
    %89 = vector.extract_strided_slice %0 {offsets = [11, 0], sizes = [1, 64], strides = [1, 1]} : vector<14x128xf32> to vector<1x64xf32>
    %90 = vector.shape_cast %89 : vector<1x64xf32> to vector<64xf32>
    %c0_24 = arith.constant 0 : index
    %c0_25 = arith.constant 0 : index
    %91 = vector.load %arg6[%c0_24, %c0_25] : memref<32x64xf32, #tpu.memory_space<vmem>>, vector<32x64xf32>
    %92 = vector.extract_strided_slice %0 {offsets = [12, 0], sizes = [1, 64], strides = [1, 1]} : vector<14x128xf32> to vector<1x64xf32>
    %93 = vector.shape_cast %92 : vector<1x64xf32> to vector<64xf32>
    %cst_26 = arith.constant dense<0.000000e+00> : vector<8x64xf32>
    %94 = tpu.matmul %76, %91, %cst_26 {dimension_numbers = #tpu.dot_dimension_numbers<[1], [0], [0], [1], [0, 0, 1, 1], [], []>} : vector<8x32xf32>, vector<32x64xf32>, vector<8x64xf32> -> vector<8x64xf32>
    %95 = vector.shape_cast %93 : vector<64xf32> to vector<1x64xf32>
    %96 = vector.broadcast %95 : vector<1x64xf32> to vector<8x64xf32>
    %97 = arith.addf %94, %96 : vector<8x64xf32>
    %cst_27 = arith.constant dense<0.000000e+00> : vector<8x64xf32>
    %98 = tpu.matmul %76, %77, %cst_27 {dimension_numbers = #tpu.dot_dimension_numbers<[1], [0], [0], [1], [0, 0, 1, 1], [], []>} : vector<8x32xf32>, vector<32x64xf32>, vector<8x64xf32> -> vector<8x64xf32>
    %99 = vector.shape_cast %79 : vector<64xf32> to vector<1x64xf32>
    %100 = vector.broadcast %99 : vector<1x64xf32> to vector<8x64xf32>
    %101 = arith.addf %98, %100 : vector<8x64xf32>
    %cst_28 = arith.constant dense<0.000000e+00> : vector<8xf32>
    %102 = vector.multi_reduction <add>, %101, %cst_28 [1] : vector<8x64xf32> to vector<8xf32>
    %103 = vector.shape_cast %102 : vector<8xf32> to vector<8x1xf32>
    %cst_29 = arith.constant 6.400000e+01 : f32
    %104 = vector.broadcast %cst_29 : f32 to vector<8x1xf32>
    %105 = arith.divf %103, %104 : vector<8x1xf32>
    %106 = vector.broadcast %105 : vector<8x1xf32> to vector<8x64xf32>
    %107 = arith.subf %101, %106 : vector<8x64xf32>
    %108 = arith.mulf %107, %107 : vector<8x64xf32>
    %cst_30 = arith.constant dense<0.000000e+00> : vector<8xf32>
    %109 = vector.multi_reduction <add>, %108, %cst_30 [1] : vector<8x64xf32> to vector<8xf32>
    %110 = vector.shape_cast %109 : vector<8xf32> to vector<8x1xf32>
    %cst_31 = arith.constant 6.400000e+01 : f32
    %111 = vector.broadcast %cst_31 : f32 to vector<8x1xf32>
    %112 = arith.divf %110, %111 : vector<8x1xf32>
    %113 = vector.broadcast %105 : vector<8x1xf32> to vector<8x64xf32>
    %114 = arith.subf %101, %113 : vector<8x64xf32>
    %cst_32 = arith.constant 9.99999974E-6 : f32
    %115 = vector.broadcast %cst_32 : f32 to vector<8x1xf32>
    %116 = arith.addf %112, %115 : vector<8x1xf32>
    %117 = math.rsqrt %116 : vector<8x1xf32>
    %118 = vector.broadcast %117 : vector<8x1xf32> to vector<8x64xf32>
    %119 = arith.mulf %114, %118 : vector<8x64xf32>
    %120 = vector.shape_cast %81 : vector<64xf32> to vector<1x64xf32>
    %121 = vector.broadcast %120 : vector<1x64xf32> to vector<8x64xf32>
    %122 = arith.mulf %119, %121 : vector<8x64xf32>
    %123 = vector.shape_cast %83 : vector<64xf32> to vector<1x64xf32>
    %124 = vector.broadcast %123 : vector<1x64xf32> to vector<8x64xf32>
    %125 = arith.addf %122, %124 : vector<8x64xf32>
    %cst_33 = arith.constant 0.000000e+00 : f32
    %126 = vector.broadcast %cst_33 : f32 to vector<8x64xf32>
    %127 = arith.maximumf %125, %126 : vector<8x64xf32>
    %cst_34 = arith.constant dense<0.000000e+00> : vector<8x64xf32>
    %128 = tpu.matmul %127, %84, %cst_34 {dimension_numbers = #tpu.dot_dimension_numbers<[1], [0], [0], [1], [0, 0, 1, 1], [], []>} : vector<8x64xf32>, vector<64x64xf32>, vector<8x64xf32> -> vector<8x64xf32>
    %129 = vector.shape_cast %86 : vector<64xf32> to vector<1x64xf32>
    %130 = vector.broadcast %129 : vector<1x64xf32> to vector<8x64xf32>
    %131 = arith.addf %128, %130 : vector<8x64xf32>
    %cst_35 = arith.constant dense<0.000000e+00> : vector<8xf32>
    %132 = vector.multi_reduction <add>, %131, %cst_35 [1] : vector<8x64xf32> to vector<8xf32>
    %133 = vector.shape_cast %132 : vector<8xf32> to vector<8x1xf32>
    %cst_36 = arith.constant 6.400000e+01 : f32
    %134 = vector.broadcast %cst_36 : f32 to vector<8x1xf32>
    %135 = arith.divf %133, %134 : vector<8x1xf32>
    %136 = vector.broadcast %135 : vector<8x1xf32> to vector<8x64xf32>
    %137 = arith.subf %131, %136 : vector<8x64xf32>
    %138 = arith.mulf %137, %137 : vector<8x64xf32>
    %cst_37 = arith.constant dense<0.000000e+00> : vector<8xf32>
    %139 = vector.multi_reduction <add>, %138, %cst_37 [1] : vector<8x64xf32> to vector<8xf32>
    %140 = vector.shape_cast %139 : vector<8xf32> to vector<8x1xf32>
    %cst_38 = arith.constant 6.400000e+01 : f32
    %141 = vector.broadcast %cst_38 : f32 to vector<8x1xf32>
    %142 = arith.divf %140, %141 : vector<8x1xf32>
    %143 = vector.broadcast %135 : vector<8x1xf32> to vector<8x64xf32>
    %144 = arith.subf %131, %143 : vector<8x64xf32>
    %cst_39 = arith.constant 9.99999974E-6 : f32
    %145 = vector.broadcast %cst_39 : f32 to vector<8x1xf32>
    %146 = arith.addf %142, %145 : vector<8x1xf32>
    %147 = math.rsqrt %146 : vector<8x1xf32>
    %148 = vector.broadcast %147 : vector<8x1xf32> to vector<8x64xf32>
    %149 = arith.mulf %144, %148 : vector<8x64xf32>
    %150 = vector.shape_cast %88 : vector<64xf32> to vector<1x64xf32>
    %151 = vector.broadcast %150 : vector<1x64xf32> to vector<8x64xf32>
    %152 = arith.mulf %149, %151 : vector<8x64xf32>
    %153 = vector.shape_cast %90 : vector<64xf32> to vector<1x64xf32>
    %154 = vector.broadcast %153 : vector<1x64xf32> to vector<8x64xf32>
    %155 = arith.addf %152, %154 : vector<8x64xf32>
    %156 = arith.addf %155, %97 : vector<8x64xf32>
    %cst_40 = arith.constant 0.000000e+00 : f32
    %157 = vector.broadcast %cst_40 : f32 to vector<8x64xf32>
    %158 = arith.maximumf %156, %157 : vector<8x64xf32>
    %c0_41 = arith.constant 0 : index
    %c0_42 = arith.constant 0 : index
    %159 = vector.load %arg7[%c0_41, %c0_42] : memref<64x128xf32, #tpu.memory_space<vmem>>, vector<64x128xf32>
    %160 = vector.extract_strided_slice %0 {offsets = [13, 0], sizes = [1, 128], strides = [1, 1]} : vector<14x128xf32> to vector<1x128xf32>
    %161 = vector.shape_cast %160 : vector<1x128xf32> to vector<128xf32>
    %cst_43 = arith.constant dense<0.000000e+00> : vector<8x128xf32>
    %162 = tpu.matmul %158, %159, %cst_43 {dimension_numbers = #tpu.dot_dimension_numbers<[1], [0], [0], [1], [0, 0, 1, 1], [], []>} : vector<8x64xf32>, vector<64x128xf32>, vector<8x128xf32> -> vector<8x128xf32>
    %163 = vector.shape_cast %161 : vector<128xf32> to vector<1x128xf32>
    %164 = vector.broadcast %163 : vector<1x128xf32> to vector<8x128xf32>
    %165 = arith.addf %162, %164 : vector<8x128xf32>
    %c0_44 = arith.constant 0 : index
    %c0_45 = arith.constant 0 : index
    %166 = vector.load %arg9[%c0_44, %c0_45] : memref<8x128xf32, #tpu.memory_space<vmem>>, vector<8x128xf32>
    tpu.vector_store %arg9[%c0_44, %c0_45], %165 {strides = array<i32>} : memref<8x128xf32, #tpu.memory_space<vmem>>, vector<8x128xf32>,
    return
  }
  func.func @transform_0(%arg0: i32) -> (i32, i32) {
    %c0_i32 = arith.constant 0 : i32
    %c0_i32_0 = arith.constant 0 : i32
    return %arg0, %c0_i32 : i32, i32
  }
  func.func @transform_1(%arg0: i32) -> (i32, i32) {
    %c0_i32 = arith.constant 0 : i32
    %c0_i32_0 = arith.constant 0 : i32
    %c0_i32_1 = arith.constant 0 : i32
    return %c0_i32, %c0_i32_0 : i32, i32
  }
  func.func @transform_2(%arg0: i32) -> (i32, i32) {
    %c0_i32 = arith.constant 0 : i32
    %c0_i32_0 = arith.constant 0 : i32
    %c0_i32_1 = arith.constant 0 : i32
    return %c0_i32, %c0_i32_0 : i32, i32
  }
  func.func @transform_3(%arg0: i32) -> (i32, i32) {
    %c0_i32 = arith.constant 0 : i32
    %c0_i32_0 = arith.constant 0 : i32
    %c0_i32_1 = arith.constant 0 : i32
    return %c0_i32, %c0_i32_0 : i32, i32
  }
  func.func @transform_4(%arg0: i32) -> (i32, i32) {
    %c0_i32 = arith.constant 0 : i32
    %c0_i32_0 = arith.constant 0 : i32
    %c0_i32_1 = arith.constant 0 : i32
    return %c0_i32, %c0_i32_0 : i32, i32
  }
  func.func @transform_5(%arg0: i32) -> (i32, i32) {
    %c0_i32 = arith.constant 0 : i32
    %c0_i32_0 = arith.constant 0 : i32
    %c0_i32_1 = arith.constant 0 : i32
    return %c0_i32, %c0_i32_0 : i32, i32
  }
  func.func @transform_6(%arg0: i32) -> (i32, i32) {
    %c0_i32 = arith.constant 0 : i32
    %c0_i32_0 = arith.constant 0 : i32
    %c0_i32_1 = arith.constant 0 : i32
    return %c0_i32, %c0_i32_0 : i32, i32
  }
  func.func @transform_7(%arg0: i32) -> (i32, i32) {
    %c0_i32 = arith.constant 0 : i32
    %c0_i32_0 = arith.constant 0 : i32
    %c0_i32_1 = arith.constant 0 : i32
    return %c0_i32, %c0_i32_0 : i32, i32
  }
  func.func @transform_8(%arg0: i32) -> (i32, i32) {
    %c0_i32 = arith.constant 0 : i32
    %c0_i32_0 = arith.constant 0 : i32
    return %arg0, %c0_i32 : i32, i32
  }
}

module attributes {stable_mosaic.version = 11 : i64} {
  func.func @kernel(%arg0: i32, %arg1: memref<8x32xf32, #tpu.memory_space<vmem>>, %arg2: memref<32x32xf32, #tpu.memory_space<vmem>>, %arg3: memref<32x32xf32, #tpu.memory_space<vmem>>, %arg4: memref<32x64xf32, #tpu.memory_space<vmem>>, %arg5: memref<64x64xf32, #tpu.memory_space<vmem>>, %arg6: memref<32x64xf32, #tpu.memory_space<vmem>>, %arg7: memref<64x128xf32, #tpu.memory_space<vmem>>, %arg8: memref<14x128xf32, #tpu.memory_space<vmem>>, %arg9: memref<8x128xf32, #tpu.memory_space<vmem>>) attributes {dimension_semantics = [#tpu.dimension_semantics<parallel>], iteration_bounds = array<i64: 1>, scalar_prefetch = 0 : i64, scratch_operands = 0 : i64, tpu.core_type = #tpu.core_type<tc>, window_params = [{transform_indices = @transform_0, window_bounds = array<i64: 8, 32>}, {pipeline_mode = #tpu.pipeline_mode<synchronous>, transform_indices = @transform_1, window_bounds = array<i64: 32, 32>}, {pipeline_mode = #tpu.pipeline_mode<synchronous>, transform_indices = @transform_2, window_bounds = array<i64: 32, 32>}, {pipeline_mode = #tpu.pipeline_mode<synchronous>, transform_indices = @transform_3, window_bounds = array<i64: 32, 64>}, {pipeline_mode = #tpu.pipeline_mode<synchronous>, transform_indices = @transform_4, window_bounds = array<i64: 64, 64>}, {pipeline_mode = #tpu.pipeline_mode<synchronous>, transform_indices = @transform_5, window_bounds = array<i64: 32, 64>}, {pipeline_mode = #tpu.pipeline_mode<synchronous>, transform_indices = @transform_6, window_bounds = array<i64: 64, 128>}, {pipeline_mode = #tpu.pipeline_mode<synchronous>, transform_indices = @transform_7, window_bounds = array<i64: 14, 128>}, {transform_indices = @transform_8, window_bounds = array<i64: 8, 128>}]} {
    %c0 = arith.constant 0 : index
    %c0_0 = arith.constant 0 : index
    %0 = vector.load %arg8[%c0, %c0_0] : memref<14x128xf32, #tpu.memory_space<vmem>>, vector<14x128xf32>
    %c0_1 = arith.constant 0 : index
    %c0_2 = arith.constant 0 : index
    %1 = vector.load %arg1[%c0_1, %c0_2] : memref<8x32xf32, #tpu.memory_space<vmem>>, vector<8x32xf32>
    %c0_3 = arith.constant 0 : index
    %c0_4 = arith.constant 0 : index
    %2 = vector.load %arg2[%c0_3, %c0_4] : memref<32x32xf32, #tpu.memory_space<vmem>>, vector<32x32xf32>
    %3 = vector.extract_strided_slice %0 {offsets = [0, 0], sizes = [1, 32], strides = [1, 1]} : vector<14x128xf32> to vector<1x32xf32>
    %4 = vector.shape_cast %3 : vector<1x32xf32> to vector<32xf32>
    %5 = vector.extract_strided_slice %0 {offsets = [1, 0], sizes = [1, 32], strides = [1, 1]} : vector<14x128xf32> to vector<1x32xf32>
    %6 = vector.shape_cast %5 : vector<1x32xf32> to vector<32xf32>
    %7 = vector.extract_strided_slice %0 {offsets = [2, 0], sizes = [1, 32], strides = [1, 1]} : vector<14x128xf32> to vector<1x32xf32>
    %8 = vector.shape_cast %7 : vector<1x32xf32> to vector<32xf32>
    %c0_5 = arith.constant 0 : index
    %c0_6 = arith.constant 0 : index
    %9 = vector.load %arg3[%c0_5, %c0_6] : memref<32x32xf32, #tpu.memory_space<vmem>>, vector<32x32xf32>
    %10 = vector.extract_strided_slice %0 {offsets = [3, 0], sizes = [1, 32], strides = [1, 1]} : vector<14x128xf32> to vector<1x32xf32>
    %11 = vector.shape_cast %10 : vector<1x32xf32> to vector<32xf32>
    %12 = vector.extract_strided_slice %0 {offsets = [4, 0], sizes = [1, 32], strides = [1, 1]} : vector<14x128xf32> to vector<1x32xf32>
    %13 = vector.shape_cast %12 : vector<1x32xf32> to vector<32xf32>
    %14 = vector.extract_strided_slice %0 {offsets = [5, 0], sizes = [1, 32], strides = [1, 1]} : vector<14x128xf32> to vector<1x32xf32>
    %15 = vector.shape_cast %14 : vector<1x32xf32> to vector<32xf32>
    %cst = arith.constant dense<0.000000e+00> : vector<8x32xf32>
    %16 = tpu.matmul %1, %2, %cst {dimension_numbers = #tpu.dot_dimension_numbers<[1], [0], [0], [1], [0, 0, 1, 1], [], []>} : vector<8x32xf32>, vector<32x32xf32>, vector<8x32xf32> -> vector<8x32xf32>
    %17 = vector.shape_cast %4 : vector<32xf32> to vector<1x32xf32>
    %18 = vector.broadcast %17 : vector<1x32xf32> to vector<8x32xf32>
    %19 = arith.addf %16, %18 : vector<8x32xf32>
    %cst_7 = arith.constant dense<0.000000e+00> : vector<8xf32>
    %20 = vector.multi_reduction <add>, %19, %cst_7 [1] : vector<8x32xf32> to vector<8xf32>
    %21 = vector.shape_cast %20 : vector<8xf32> to vector<8x1xf32>
    %cst_8 = arith.constant 3.200000e+01 : f32
    %22 = vector.broadcast %cst_8 : f32 to vector<8x1xf32>
    %23 = arith.divf %21, %22 : vector<8x1xf32>
    %24 = vector.broadcast %23 : vector<8x1xf32> to vector<8x32xf32>
    %25 = arith.subf %19, %24 : vector<8x32xf32>
    %26 = arith.mulf %25, %25 : vector<8x32xf32>
    %cst_9 = arith.constant dense<0.000000e+00> : vector<8xf32>
    %27 = vector.multi_reduction <add>, %26, %cst_9 [1] : vector<8x32xf32> to vector<8xf32>
    %28 = vector.shape_cast %27 : vector<8xf32> to vector<8x1xf32>
    %cst_10 = arith.constant 3.200000e+01 : f32
    %29 = vector.broadcast %cst_10 : f32 to vector<8x1xf32>
    %30 = arith.divf %28, %29 : vector<8x1xf32>
    %31 = vector.broadcast %23 : vector<8x1xf32> to vector<8x32xf32>
    %32 = arith.subf %19, %31 : vector<8x32xf32>
    %cst_11 = arith.constant 9.99999974E-6 : f32
    %33 = vector.broadcast %cst_11 : f32 to vector<8x1xf32>
    %34 = arith.addf %30, %33 : vector<8x1xf32>
    %35 = math.rsqrt %34 : vector<8x1xf32>
    %36 = vector.broadcast %35 : vector<8x1xf32> to vector<8x32xf32>
    %37 = arith.mulf %32, %36 : vector<8x32xf32>
    %38 = vector.shape_cast %6 : vector<32xf32> to vector<1x32xf32>
    %39 = vector.broadcast %38 : vector<1x32xf32> to vector<8x32xf32>
    %40 = arith.mulf %37, %39 : vector<8x32xf32>
    %41 = vector.shape_cast %8 : vector<32xf32> to vector<1x32xf32>
    %42 = vector.broadcast %41 : vector<1x32xf32> to vector<8x32xf32>
    %43 = arith.addf %40, %42 : vector<8x32xf32>
    %cst_12 = arith.constant 0.000000e+00 : f32
    %44 = vector.broadcast %cst_12 : f32 to vector<8x32xf32>
    %45 = arith.maximumf %43, %44 : vector<8x32xf32>
    %cst_13 = arith.constant dense<0.000000e+00> : vector<8x32xf32>
    %46 = tpu.matmul %45, %9, %cst_13 {dimension_numbers = #tpu.dot_dimension_numbers<[1], [0], [0], [1], [0, 0, 1, 1], [], []>} : vector<8x32xf32>, vector<32x32xf32>, vector<8x32xf32> -> vector<8x32xf32>
    %47 = vector.shape_cast %11 : vector<32xf32> to vector<1x32xf32>
    %48 = vector.broadcast %47 : vector<1x32xf32> to vector<8x32xf32>
    %49 = arith.addf %46, %48 : vector<8x32xf32>
    %cst_14 = arith.constant dense<0.000000e+00> : vector<8xf32>
    %50 = vector.multi_reduction <add>, %49, %cst_14 [1] : vector<8x32xf32> to vector<8xf32>
    %51 = vector.shape_cast %50 : vector<8xf32> to vector<8x1xf32>
    %cst_15 = arith.constant 3.200000e+01 : f32
    %52 = vector.broadcast %cst_15 : f32 to vector<8x1xf32>
    %53 = arith.divf %51, %52 : vector<8x1xf32>
    %54 = vector.broadcast %53 : vector<8x1xf32> to vector<8x32xf32>
    %55 = arith.subf %49, %54 : vector<8x32xf32>
    %56 = arith.mulf %55, %55 : vector<8x32xf32>
    %cst_16 = arith.constant dense<0.000000e+00> : vector<8xf32>
    %57 = vector.multi_reduction <add>, %56, %cst_16 [1] : vector<8x32xf32> to vector<8xf32>
    %58 = vector.shape_cast %57 : vector<8xf32> to vector<8x1xf32>
    %cst_17 = arith.constant 3.200000e+01 : f32
    %59 = vector.broadcast %cst_17 : f32 to vector<8x1xf32>
    %60 = arith.divf %58, %59 : vector<8x1xf32>
    %61 = vector.broadcast %53 : vector<8x1xf32> to vector<8x32xf32>
    %62 = arith.subf %49, %61 : vector<8x32xf32>
    %cst_18 = arith.constant 9.99999974E-6 : f32
    %63 = vector.broadcast %cst_18 : f32 to vector<8x1xf32>
    %64 = arith.addf %60, %63 : vector<8x1xf32>
    %65 = math.rsqrt %64 : vector<8x1xf32>
    %66 = vector.broadcast %65 : vector<8x1xf32> to vector<8x32xf32>
    %67 = arith.mulf %62, %66 : vector<8x32xf32>
    %68 = vector.shape_cast %13 : vector<32xf32> to vector<1x32xf32>
    %69 = vector.broadcast %68 : vector<1x32xf32> to vector<8x32xf32>
    %70 = arith.mulf %67, %69 : vector<8x32xf32>
    %71 = vector.shape_cast %15 : vector<32xf32> to vector<1x32xf32>
    %72 = vector.broadcast %71 : vector<1x32xf32> to vector<8x32xf32>
    %73 = arith.addf %70, %72 : vector<8x32xf32>
    %74 = arith.addf %73, %1 : vector<8x32xf32>
    %cst_19 = arith.constant 0.000000e+00 : f32
    %75 = vector.broadcast %cst_19 : f32 to vector<8x32xf32>
    %76 = arith.maximumf %74, %75 : vector<8x32xf32>
    %c0_20 = arith.constant 0 : index
    %c0_21 = arith.constant 0 : index
    %77 = vector.load %arg4[%c0_20, %c0_21] : memref<32x64xf32, #tpu.memory_space<vmem>>, vector<32x64xf32>
    %78 = vector.extract_strided_slice %0 {offsets = [6, 0], sizes = [1, 64], strides = [1, 1]} : vector<14x128xf32> to vector<1x64xf32>
    %79 = vector.shape_cast %78 : vector<1x64xf32> to vector<64xf32>
    %80 = vector.extract_strided_slice %0 {offsets = [7, 0], sizes = [1, 64], strides = [1, 1]} : vector<14x128xf32> to vector<1x64xf32>
    %81 = vector.shape_cast %80 : vector<1x64xf32> to vector<64xf32>
    %82 = vector.extract_strided_slice %0 {offsets = [8, 0], sizes = [1, 64], strides = [1, 1]} : vector<14x128xf32> to vector<1x64xf32>
    %83 = vector.shape_cast %82 : vector<1x64xf32> to vector<64xf32>
    %c0_22 = arith.constant 0 : index
    %c0_23 = arith.constant 0 : index
    %84 = vector.load %arg5[%c0_22, %c0_23] : memref<64x64xf32, #tpu.memory_space<vmem>>, vector<64x64xf32>
    %85 = vector.extract_strided_slice %0 {offsets = [9, 0], sizes = [1, 64], strides = [1, 1]} : vector<14x128xf32> to vector<1x64xf32>
    %86 = vector.shape_cast %85 : vector<1x64xf32> to vector<64xf32>
    %87 = vector.extract_strided_slice %0 {offsets = [10, 0], sizes = [1, 64], strides = [1, 1]} : vector<14x128xf32> to vector<1x64xf32>
    %88 = vector.shape_cast %87 : vector<1x64xf32> to vector<64xf32>
    %89 = vector.extract_strided_slice %0 {offsets = [11, 0], sizes = [1, 64], strides = [1, 1]} : vector<14x128xf32> to vector<1x64xf32>
    %90 = vector.shape_cast %89 : vector<1x64xf32> to vector<64xf32>
    %c0_24 = arith.constant 0 : index
    %c0_25 = arith.constant 0 : index
    %91 = vector.load %arg6[%c0_24, %c0_25] : memref<32x64xf32, #tpu.memory_space<vmem>>, vector<32x64xf32>
    %92 = vector.extract_strided_slice %0 {offsets = [12, 0], sizes = [1, 64], strides = [1, 1]} : vector<14x128xf32> to vector<1x64xf32>
    %93 = vector.shape_cast %92 : vector<1x64xf32> to vector<64xf32>
    %cst_26 = arith.constant dense<0.000000e+00> : vector<8x64xf32>
    %94 = tpu.matmul %76, %91, %cst_26 {dimension_numbers = #tpu.dot_dimension_numbers<[1], [0], [0], [1], [0, 0, 1, 1], [], []>} : vector<8x32xf32>, vector<32x64xf32>, vector<8x64xf32> -> vector<8x64xf32>
    %95 = vector.shape_cast %93 : vector<64xf32> to vector<1x64xf32>
    %96 = vector.broadcast %95 : vector<1x64xf32> to vector<8x64xf32>
    %97 = arith.addf %94, %96 : vector<8x64xf32>
    %cst_27 = arith.constant dense<0.000000e+00> : vector<8x64xf32>
    %98 = tpu.matmul %76, %77, %cst_27 {dimension_numbers = #tpu.dot_dimension_numbers<[1], [0], [0], [1], [0, 0, 1, 1], [], []>} : vector<8x32xf32>, vector<32x64xf32>, vector<8x64xf32> -> vector<8x64xf32>
    %99 = vector.shape_cast %79 : vector<64xf32> to vector<1x64xf32>
    %100 = vector.broadcast %99 : vector<1x64xf32> to vector<8x64xf32>
    %101 = arith.addf %98, %100 : vector<8x64xf32>
    %cst_28 = arith.constant dense<0.000000e+00> : vector<8xf32>
    %102 = vector.multi_reduction <add>, %101, %cst_28 [1] : vector<8x64xf32> to vector<8xf32>
    %103 = vector.shape_cast %102 : vector<8xf32> to vector<8x1xf32>
    %cst_29 = arith.constant 6.400000e+01 : f32
    %104 = vector.broadcast %cst_29 : f32 to vector<8x1xf32>
    %105 = arith.divf %103, %104 : vector<8x1xf32>
    %106 = vector.broadcast %105 : vector<8x1xf32> to vector<8x64xf32>
    %107 = arith.subf %101, %106 : vector<8x64xf32>
    %108 = arith.mulf %107, %107 : vector<8x64xf32>
    %cst_30 = arith.constant dense<0.000000e+00> : vector<8xf32>
    %109 = vector.multi_reduction <add>, %108, %cst_30 [1] : vector<8x64xf32> to vector<8xf32>
    %110 = vector.shape_cast %109 : vector<8xf32> to vector<8x1xf32>
    %cst_31 = arith.constant 6.400000e+01 : f32
    %111 = vector.broadcast %cst_31 : f32 to vector<8x1xf32>
    %112 = arith.divf %110, %111 : vector<8x1xf32>
    %113 = vector.broadcast %105 : vector<8x1xf32> to vector<8x64xf32>
    %114 = arith.subf %101, %113 : vector<8x64xf32>
    %cst_32 = arith.constant 9.99999974E-6 : f32
    %115 = vector.broadcast %cst_32 : f32 to vector<8x1xf32>
    %116 = arith.addf %112, %115 : vector<8x1xf32>
    %117 = math.rsqrt %116 : vector<8x1xf32>
    %118 = vector.broadcast %117 : vector<8x1xf32> to vector<8x64xf32>
    %119 = arith.mulf %114, %118 : vector<8x64xf32>
    %120 = vector.shape_cast %81 : vector<64xf32> to vector<1x64xf32>
    %121 = vector.broadcast %120 : vector<1x64xf32> to vector<8x64xf32>
    %122 = arith.mulf %119, %121 : vector<8x64xf32>
    %123 = vector.shape_cast %83 : vector<64xf32> to vector<1x64xf32>
    %124 = vector.broadcast %123 : vector<1x64xf32> to vector<8x64xf32>
    %125 = arith.addf %122, %124 : vector<8x64xf32>
    %cst_33 = arith.constant 0.000000e+00 : f32
    %126 = vector.broadcast %cst_33 : f32 to vector<8x64xf32>
    %127 = arith.maximumf %125, %126 : vector<8x64xf32>
    %cst_34 = arith.constant dense<0.000000e+00> : vector<8x64xf32>
    %128 = tpu.matmul %127, %84, %cst_34 {dimension_numbers = #tpu.dot_dimension_numbers<[1], [0], [0], [1], [0, 0, 1, 1], [], []>} : vector<8x64xf32>, vector<64x64xf32>, vector<8x64xf32> -> vector<8x64xf32>
    %129 = vector.shape_cast %86 : vector<64xf32> to vector<1x64xf32>
    %130 = vector.broadcast %129 : vector<1x64xf32> to vector<8x64xf32>
    %131 = arith.addf %128, %130 : vector<8x64xf32>
    %cst_35 = arith.constant dense<0.000000e+00> : vector<8xf32>
    %132 = vector.multi_reduction <add>, %131, %cst_35 [1] : vector<8x64xf32> to vector<8xf32>
    %133 = vector.shape_cast %132 : vector<8xf32> to vector<8x1xf32>
    %cst_36 = arith.constant 6.400000e+01 : f32
    %134 = vector.broadcast %cst_36 : f32 to vector<8x1xf32>
    %135 = arith.divf %133, %134 : vector<8x1xf32>
    %136 = vector.broadcast %135 : vector<8x1xf32> to vector<8x64xf32>
    %137 = arith.subf %131, %136 : vector<8x64xf32>
    %138 = arith.mulf %137, %137 : vector<8x64xf32>
    %cst_37 = arith.constant dense<0.000000e+00> : vector<8xf32>
    %139 = vector.multi_reduction <add>, %138, %cst_37 [1] : vector<8x64xf32> to vector<8xf32>
    %140 = vector.shape_cast %139 : vector<8xf32> to vector<8x1xf32>
    %cst_38 = arith.constant 6.400000e+01 : f32
    %141 = vector.broadcast %cst_38 : f32 to vector<8x1xf32>
    %142 = arith.divf %140, %141 : vector<8x1xf32>
    %143 = vector.broadcast %135 : vector<8x1xf32> to vector<8x64xf32>
    %144 = arith.subf %131, %143 : vector<8x64xf32>
    %cst_39 = arith.constant 9.99999974E-6 : f32
    %145 = vector.broadcast %cst_39 : f32 to vector<8x1xf32>
    %146 = arith.addf %142, %145 : vector<8x1xf32>
    %147 = math.rsqrt %146 : vector<8x1xf32>
    %148 = vector.broadcast %147 : vector<8x1xf32> to vector<8x64xf32>
    %149 = arith.mulf %144, %148 : vector<8x64xf32>
    %150 = vector.shape_cast %88 : vector<64xf32> to vector<1x64xf32>
    %151 = vector.broadcast %150 : vector<1x64xf32> to vector<8x64xf32>
    %152 = arith.mulf %149, %151 : vector<8x64xf32>
    %153 = vector.shape_cast %90 : vector<64xf32> to vector<1x64xf32>
    %154 = vector.broadcast %153 : vector<1x64xf32> to vector<8x64xf32>
    %155 = arith.addf %152, %154 : vector<8x64xf32>
    %156 = arith.addf %155, %97 : vector<8x64xf32>
    %cst_40 = arith.constant 0.000000e+00 : f32
    %157 = vector.broadcast %cst_40 : f32 to vector<8x64xf32>
    %158 = arith.maximumf %156, %157 : vector<8x64xf32>
    %c0_41 = arith.constant 0 : index
    %c0_42 = arith.constant 0 : index
    %159 = vector.load %arg7[%c0_41, %c0_42] : memref<64x128xf32, #tpu.memory_space<vmem>>, vector<64x128xf32>
    %160 = vector.extract_strided_slice %0 {offsets = [13, 0], sizes = [1, 128], strides = [1, 1]} : vector<14x128xf32> to vector<1x128xf32>
    %161 = vector.shape_cast %160 : vector<1x128xf32> to vector<128xf32>
    %cst_43 = arith.constant dense<0.000000e+00> : vector<8x128xf32>
    %162 = tpu.matmul %158, %159, %cst_43 {dimension_numbers = #tpu.dot_dimension_numbers<[1], [0], [0], [1], [0, 0, 1, 1], [], []>} : vector<8x64xf32>, vector<64x128xf32>, vector<8x128xf32> -> vector<8x128xf32>
    %163 = vector.shape_cast %161 : vector<128xf32> to vector<1x128xf32>
    %164 = vector.broadcast %163 : vector<1x128xf32> to vector<8x128xf32>
    %165 = arith.addf %162, %164 : vector<8x128xf32>
    %c0_44 = arith.constant 0 : index
    %c0_45 = arith.constant 0 : index
    %166 = vector.load %arg9[%c0_44, %c0_45] : memref<8x128xf32, #tpu.memory_space<vmem>>, vector<8x128xf32>
    tpu.vector_store %arg9[%c0_44, %c0_45], %165 {strides = array<i32>} : memref<8x128xf32, #tpu.memory_space<vmem>>, vector<8x128xf32>,
    return
  }
  func.func @transform_0(%arg0: i32) -> (i32, i32) {
    %c0_i32 = arith.constant 0 : i32
    %c0_i32_0 = arith.constant 0 : i32
    return %arg0, %c0_i32 : i32, i32
  }
  func.func @transform_1(%arg0: i32) -> (i32, i32) {
    %c0_i32 = arith.constant 0 : i32
    %c0_i32_0 = arith.constant 0 : i32
    %c0_i32_1 = arith.constant 0 : i32
    return %c0_i32, %c0_i32_0 : i32, i32
  }
  func.func @transform_2(%arg0: i32) -> (i32, i32) {
    %c0_i32 = arith.constant 0 : i32
    %c0_i32_0 = arith.constant 0 : i32
    %c0_i32_1 = arith.constant 0 : i32
    return %c0_i32, %c0_i32_0 : i32, i32
  }
  func.func @transform_3(%arg0: i32) -> (i32, i32) {
    %c0_i32 = arith.constant 0 : i32
    %c0_i32_0 = arith.constant 0 : i32
    %c0_i32_1 = arith.constant 0 : i32
    return %c0_i32, %c0_i32_0 : i32, i32
  }
  func.func @transform_4(%arg0: i32) -> (i32, i32) {
    %c0_i32 = arith.constant 0 : i32
    %c0_i32_0 = arith.constant 0 : i32
    %c0_i32_1 = arith.constant 0 : i32
    return %c0_i32, %c0_i32_0 : i32, i32
  }
  func.func @transform_5(%arg0: i32) -> (i32, i32) {
    %c0_i32 = arith.constant 0 : i32
    %c0_i32_0 = arith.constant 0 : i32
    %c0_i32_1 = arith.constant 0 : i32
    return %c0_i32, %c0_i32_0 : i32, i32
  }
  func.func @transform_6(%arg0: i32) -> (i32, i32) {
    %c0_i32 = arith.constant 0 : i32
    %c0_i32_0 = arith.constant 0 : i32
    %c0_i32_1 = arith.constant 0 : i32
    return %c0_i32, %c0_i32_0 : i32, i32
  }
  func.func @transform_7(%arg0: i32) -> (i32, i32) {
    %c0_i32 = arith.constant 0 : i32
    %c0_i32_0 = arith.constant 0 : i32
    %c0_i32_1 = arith.constant 0 : i32
    return %c0_i32, %c0_i32_0 : i32, i32
  }
  func.func @transform_8(%arg0: i32) -> (i32, i32) {
    %c0_i32 = arith.constant 0 : i32
    %c0_i32_0 = arith.constant 0 : i32
    return %arg0, %c0_i32 : i32, i32
  }
}

</mosaic_0001>

<bundles_post_ra>
// kernel: tpu_custom_call.1
= control target key start
LH: loop header
LB: loop body
LE: loop exit
PB: predicated region body
PF: predicated region fallthrough
CT: control target
= control target key end

     0   :  { %13 = vsyncpa [#allocation3], 0  ;;  %s1311_s0 = inlined_call_operand.hbm [shape: f32[8,32], index: 0, kind: input, shape index: {}]   ;;  %s1312_s1 = inlined_call_operand.hbm [shape: f32[32,32], index: 1, kind: input, shape index: {}]   ;;  %s1313_s2 = inlined_call_operand.hbm [shape: f32[32,32], index: 2, kind: input, shape index: {}]   ;;  %s1314_s3 = inlined_call_operand.hbm [shape: f32[32,64], index: 3, kind: input, shape index: {}]   ;;  %s1315_s4 = inlined_call_operand.hbm [shape: f32[64,64], index: 4, kind: input, shape index: {}]   ;;  %s1316_s5 = inlined_call_operand.hbm [shape: f32[32,64], index: 5, kind: input, shape index: {}]   ;;  %s1317_s6 = inlined_call_operand.hbm [shape: f32[64,128], index: 6, kind: input, shape index: {}]   ;;  %s1318_s7 = inlined_call_operand.hbm [shape: f32[14,128], index: 7, kind: input, shape index: {}]   ;;  %s1319_s8 = inlined_call_operand.hbm [shape: f32[8,128], index: 8, kind: output, shape index: {}]  }
   0x1   :  { %14 = vsyncpa [#allocation6], 0 }
   0x2   :  { %15 = vsyncpa [#allocation9], 0 }
   0x3   :  { %16 = vsyncpa [#allocation12], 0 }
   0x4   :  { %17 = vsyncpa [#allocation15], 0 }
   0x5   :  { %18 = vsyncpa [#allocation4], 0  ;;  %s1092_s27 = smov [#allocation5]  }
   0x6   :  { %s34_s28 = sshll.u32 %s1092_s27, 4  ;;  %s35_s28 = int_to_ptr.vmem [resolvable:$true] %s34_s28 }
   0x7   :  { %s908_s29 = scalar_lea.vmem %s35_s28, 512  ;;  %p913_p1 = scmp.lt.s32.totalorder %s35_s28, %s35_s28 }
   0x8   :  { %p909_p0 = scmp.ne.s32.totalorder %s35_s28, %s908_s29  ;;  %p914_p2 = scmp.lt.s32.totalorder %s908_s29, %s908_s29 }
   0xa   :  { %p915_p3 = por %p914_p2, %p913_p1 }
   0xc   :  { %p916_p4 = pnand %p915_p3, %p909_p0 }
   0xe   :  { %919 = shalt.err (!%p916_p4)
}
   0xf   :  { %s1093_s30 = smov 128   ;;  %s1094_s9 = smov 8  }
  0x10   :  { %40 = dma.hbm_to_vmem [thread:$0]  %s1312_s1, 512, %s35_s28, [#allocation6], %s1093_s30, %s1093_s30, %s1094_s9  }
  0x11   :  { %s1095_s12 = smov [#allocation8]   ;;  %s1096_s14 = smov [#allocation11]  }
  0x12   :  { %s58_s13 = sshll.u32 %s1095_s12, 4  ;;  %s82_s15 = sshll.u32 %s1096_s14, 4  ;;  %s59_s13 = int_to_ptr.vmem [resolvable:$true] %s58_s13  ;;  %s83_s15 = int_to_ptr.vmem [resolvable:$true] %s82_s15 }
  0x13   :  { %s928_s16 = scalar_lea.vmem %s59_s13, 512  ;;  %p933_p6 = scmp.lt.s32.totalorder %s59_s13, %s59_s13 }
  0x14   :  { %p929_p5 = scmp.ne.s32.totalorder %s59_s13, %s928_s16  ;;  %p934_p7 = scmp.lt.s32.totalorder %s928_s16, %s928_s16 }
  0x16   :  { %p935_p8 = por %p934_p7, %p933_p6 }
  0x18   :  { %p936_p9 = pnand %p935_p8, %p929_p5 }
  0x1a   :  { %939 = shalt.err (!%p936_p9)
}
  0x1b   :  { %64 = dma.hbm_to_vmem [thread:$0]  %s1314_s3, 512, %s59_s13, [#allocation9], %s1093_s30, %s1093_s30, %s1094_s9  }
  0x1c   :  { %s948_s1 = scalar_lea.vmem %s83_s15, 512  ;;  %p953_p11 = scmp.lt.s32.totalorder %s83_s15, %s83_s15 }
  0x1d   :  { %p949_p10 = scmp.ne.s32.totalorder %s83_s15, %s948_s1  ;;  %p954_p12 = scmp.lt.s32.totalorder %s948_s1, %s948_s1 }
  0x1f   :  { %p955_p13 = por %p954_p12, %p953_p11 }
  0x21   :  { %p956_p0 = pnand %p955_p13, %p949_p10 }
  0x23   :  { %959 = shalt.err (!%p956_p0)
}
  0x24   :  { %88 = dma.hbm_to_vmem [thread:$0]  %s1316_s5, 512, %s83_s15, [#allocation12], %s1093_s30, %s1093_s30, %s1094_s9  }
  0x25   :  { %s1097_s21 = smov [#allocation2]   ;;  %s1098_s23 = smov [#allocation7]  }
  0x26   :  { %s25_s22 = sshll.u32 %s1097_s21, 4  ;;  %s46_s3 = sshll.u32 %s1098_s23, 4  ;;  %s26_s22 = int_to_ptr.vmem [resolvable:$true] %s25_s22  ;;  %s47_s3 = int_to_ptr.vmem [resolvable:$true] %s46_s3 }
  0x27   :  { %s968_s24 = scalar_lea.vmem %s26_s22, 128  ;;  %p973_p2 = scmp.lt.s32.totalorder %s26_s22, %s26_s22 }
  0x28   :  { %p969_p1 = scmp.ne.s32.totalorder %s26_s22, %s968_s24  ;;  %p974_p3 = scmp.lt.s32.totalorder %s968_s24, %s968_s24 }
  0x2a   :  { %p975_p4 = por %p974_p3, %p973_p2 }
  0x2c   :  { %p976_p5 = pnand %p975_p4, %p969_p1 }
  0x2e   :  { %979 = shalt.err (!%p976_p5)
}
  0x2f   :  { %28 = dma.hbm_to_vmem [thread:$0]  %s1311_s0, 128, %s26_s22, [#allocation3]  }
  0x30   :  { %s988_s27 = scalar_lea.vmem %s47_s3, 512  ;;  %p993_p7 = scmp.lt.s32.totalorder %s47_s3, %s47_s3 }
  0x31   :  { %p989_p6 = scmp.ne.s32.totalorder %s47_s3, %s988_s27  ;;  %p994_p8 = scmp.lt.s32.totalorder %s988_s27, %s988_s27 }
  0x33   :  { %p995_p9 = por %p994_p8, %p993_p7 }
  0x35   :  { %p996_p10 = pnand %p995_p9, %p989_p6 }
  0x37   :  { %999 = shalt.err (!%p996_p10)
}
  0x38   :  { %52 = dma.hbm_to_vmem [thread:$0]  %s1313_s2, 512, %s47_s3, [#allocation6], %s1093_s30, %s1093_s30, %s1094_s9  }
  0x39   :  { %s1099_s29 = smov [#allocation10]   ;;  %s1100_s11 = smov [#allocation13]  }
  0x3a   :  { %s70_s10 = sshll.u32 %s1099_s29, 4  ;;  %s94_s0 = sshll.u32 %s1100_s11, 4  ;;  %s71_s10 = int_to_ptr.vmem [resolvable:$true] %s70_s10  ;;  %s95_s0 = int_to_ptr.vmem [resolvable:$true] %s94_s0 }
  0x3b   :  { %s1008_s12 = scalar_lea.vmem %s71_s10, 1024  ;;  %p1013_p12 = scmp.lt.s32.totalorder %s71_s10, %s71_s10 }
  0x3c   :  { %p1009_p11 = scmp.ne.s32.totalorder %s71_s10, %s1008_s12  ;;  %p1014_p13 = scmp.lt.s32.totalorder %s1008_s12, %s1008_s12 }
  0x3e   :  { %p1015_p0 = por %p1014_p13, %p1013_p12 }
  0x40   :  { %p1016_p1 = pnand %p1015_p0, %p1009_p11 }
  0x42   :  { %1019 = shalt.err (!%p1016_p1)
}
  0x43   :  { %76 = dma.hbm_to_vmem [thread:$0]  %s1315_s4, 1024, %s71_s10, [#allocation9], %s1093_s30, %s1093_s30, %s1094_s9  }
  0x44   :  { %s1028_s2 = scalar_lea.vmem %s95_s0, 1024  ;;  %p1033_p3 = scmp.lt.s32.totalorder %s95_s0, %s95_s0 }
  0x45   :  { %p1029_p2 = scmp.ne.s32.totalorder %s95_s0, %s1028_s2  ;;  %p1034_p4 = scmp.lt.s32.totalorder %s1028_s2, %s1028_s2 }
  0x47   :  { %p1035_p5 = por %p1034_p4, %p1033_p3 }
  0x49   :  { %p1036_p6 = pnand %p1035_p5, %p1029_p2 }
  0x4b   :  { %1039 = shalt.err (!%p1036_p6)
}
  0x4c   :  { %100 = dma.hbm_to_vmem [thread:$0]  %s1317_s6, 1024, %s95_s0, [#allocation12], %s1093_s30, %s1093_s30, %s1094_s9  }
  0x4d   :  { %s1101_s17 = smov [#allocation14]  }
  0x4e   :  { %s106_s18 = sshll.u32 %s1101_s17, 4  ;;  %s107_s18 = int_to_ptr.vmem [resolvable:$true] %s106_s18 }
  0x4f   :  { %s1048_s1 = scalar_lea.vmem %s107_s18, 256  ;;  %p1053_p8 = scmp.lt.s32.totalorder %s107_s18, %s107_s18 }
  0x50   :  { %p1049_p7 = scmp.ne.s32.totalorder %s107_s18, %s1048_s1  ;;  %p1054_p9 = scmp.lt.s32.totalorder %s1048_s1, %s1048_s1 }
  0x52   :  { %p1055_p10 = por %p1054_p9, %p1053_p8 }
  0x54   :  { %p1056_p11 = pnand %p1055_p10, %p1049_p7 }
  0x56   :  { %1059 = shalt.err (!%p1056_p11)
}
  0x57   :  { %112 = dma.hbm_to_vmem [thread:$0]  %s1318_s7, 256, %s107_s18, [#allocation15], %s1093_s30, %s1093_s30, %s1094_s9  }
  0x58   :  { %1080 = dma.done.wait [#allocation3], 128  }
  0x59   :  { %1081 = vsyncadd [#allocation3], 4294967168 }
  0x5a   :  { %1082 = dma.done.wait [#allocation6], 1024  }
  0x5b   :  { %1083 = vsyncadd [#allocation6], 4294966272 }
  0x5c   :  { %1084 = dma.done.wait [#allocation9], 1536  }
  0x5d   :  { %1085 = vsyncadd [#allocation9], 4294965760 }
  0x5e   :  { %1086 = dma.done.wait [#allocation12], 1536  }
  0x5f   :  { %1087 = vsyncadd [#allocation12], 4294965760 }
  0x60   :  { %1088 = dma.done.wait [#allocation15], 256  }
  0x61   :  { %1089 = vsyncadd [#allocation15], 4294967040  ;;  %v1102_v0 = vmov 0.0   ;;  %vm1103_vm0 = vmmov 0   ;;  %v143_v1 = vld [vmem:[#allocation5 + $0x18] sm:$0xff]  ;;  %v142_v2 = vld [vmem:[#allocation5 + $0x10] sm:$0xff]  ;;  %v148_v6 = vlaneseq }
  0x62   :  { %797 = vmatprep.subr.mxu0 %v1102_v0  ;;  %805 = vmatprep.mubr.msk.f32.mxu0 %vm1103_vm0, %v1102_v0  ;;  %v141_v3 = vld [vmem:[#allocation5 + $0x8] sm:$0xff]  ;;  %v140_v4 = vld [vmem:[#allocation5] sm:$0xff]  ;;  %v1203_v5 = vld [vmem:[#allocation2] sm:$0xff]  ;;  %vm152_vm1 = vcmask 261120   ;;  %vm520_vm2 = vcmask 523264   ;;  %s1104_s6 = smov [#allocation16]  }
  0x63   :  { %808 = vmatprep.subr.mxu1 %v1102_v0  ;;  %816 = vmatprep.mubr.msk.f32.mxu1 %vm1103_vm0, %v1102_v0  ;;  %v1211_v7 = vshrl.u32 %v148_v6, 7  ;;  %v1214_v9 = vld [vmem:[#allocation14] sm:$0xff]  ;;  %v147_v20 = vld [vmem:[#allocation7 + $0x18] sm:$0xff]  ;;  %v146_v21 = vld [vmem:[#allocation7 + $0x10] sm:$0xff]  ;;  %s740_s7 = sshll.u32 %s1104_s6, 4  ;;  %s741_s7 = int_to_ptr.vmem [resolvable:$true] %s740_s7 }
  0x64   :  { %798 = vmatpush3.msra.mxu0 %v143_v1  ;;  %809 = vmatpush3.msra.mxu1 %v147_v20  ;;  %v145_v22 = vld [vmem:[#allocation7 + $0x8] sm:$0xff]  ;;  %v144_v23 = vld [vmem:[#allocation7] sm:$0xff]  ;;  %v368_v47 = vld [vmem:[#allocation11 + $0x18] sm:$0xff]  ;;  %s1060_s30 = scalar_lea.vmem %s741_s7, 128  ;;  %p1065_p13 = scmp.lt.s32.totalorder %s741_s7, %s741_s7 }
  0x65   :  { %799 = vmatprep.subr.mxu0 %v1102_v0  ;;  %v150_v8 = vsub.s32 0, %v1211_v7  ;;  %810 = vmatprep.subr.mxu1 %v1102_v0  ;;  %v242_v27 = vsub.s32 1, %v1211_v7  ;;  %v247_v28 = vsub.s32 2, %v1211_v7  ;;  %v253_v36 = vsub.s32 3, %v1211_v7  ;;  %v356_v48 = vld [vmem:[#allocation8 + $0x18] sm:$0xff]  ;;  %v367_v49 = vld [vmem:[#allocation11 + $0x10] sm:$0xff]  ;;  %p1061_p12 = scmp.ne.s32.totalorder %s741_s7, %s1060_s30  ;;  %p1066_p0 = scmp.lt.s32.totalorder %s1060_s30, %s1060_s30 }
  0x66   :  { %800 = vmatpush3.msra.mxu0 %v142_v2  ;;  %811 = vmatpush3.msra.mxu1 %v146_v21  ;;  %v355_v50 = vld [vmem:[#allocation8 + $0x10] sm:$0xff]  ;;  %v366_v51 = vld [vmem:[#allocation11 + $0x8] sm:$0xff]  ;;  %v365_v53 = vld [vmem:[#allocation11] sm:$0xff]  ;;  %v343_v58 = vsub.s32 4, %v1211_v7  ;;  %v348_v59 = vsub.s32 5, %v1211_v7  ;;  %v448_v6 = vsub.s32 6, %v1211_v7 }
  0x67   :  { %801 = vmatprep.subr.mxu0 %v1102_v0  ;;  %v151_v10 = vrot.slane %v1214_v9, %v150_v8  ;;  %812 = vmatprep.subr.mxu1 %v1102_v0  ;;  %v243_v29 = vrot.slane %v1214_v9, %v242_v27  ;;  %v248_v32 = vrot.slane %v1214_v9, %v247_v28  ;;  %v354_v52 = vld [vmem:[#allocation8 + $0x8] sm:$0xff]  ;;  %v353_v54 = vld [vmem:[#allocation8] sm:$0xff]  ;;  %p1067_p1 = por %p1066_p0, %p1065_p13 }
  0x68   :  { %802 = vmatpush3.msra.mxu0 %v141_v3  ;;  %813 = vmatpush3.msra.mxu1 %v145_v22  ;;  %v254_v37 = vrot.slane %v1214_v9, %v253_v36  ;;  %v344_v60 = vrot.slane %v1214_v9, %v343_v58  ;;  %v349_v63 = vrot.slane %v1214_v9, %v348_v59 }
  0x69   :  { %803 = vmatprep.subr.mxu0 %v1102_v0  ;;  %814 = vmatprep.subr.mxu1 %v1102_v0  ;;  %p1068_p2 = pnand %p1067_p1, %p1061_p12 }
  0x6a   :  { %804 = vmatpush3.msra.mxu0 %v140_v4  ;;  %815 = vmatpush3.msra.mxu1 %v144_v23 }
  0x6b   :  { %806 = vmatmul.mubr.msk.f32.vlgmr.msra.gmra.mxu0 %vm152_vm1, %v1203_v5  ;;  %819 = vmatprep.subr.mxu0 %v1102_v0 }
  0x6c   :  { %827 = vmatprep.mubr.msk.f32.mxu0 %vm1103_vm0, %v1102_v0  ;;  %830 = vmatprep.subr.mxu1 %v1102_v0 }
  0x6d   :  { %820 = vmatpush3.msra.mxu0 %v368_v47 }
  0x6e   :  { %821 = vmatprep.subr.mxu0 %v1102_v0 }
  0x6f   :  { %822 = vmatpush3.msra.mxu0 %v367_v49 }
  0x70   :  { %823 = vmatprep.subr.mxu0 %v1102_v0 }
  0x71   :  { %824 = vmatpush3.msra.mxu0 %v366_v51 }
  0x72   :  { %825 = vmatprep.subr.mxu0 %v1102_v0 }
  0x73   :  { %826 = vmatpush3.msra.mxu0 %v365_v53 }
  0x74   :  { %841 = vmatprep.subr.mxu0 %v1102_v0 }
 0x12b   :  { %v222_v11 = vpop.f32.mrf.mxu0 }
 0x12c   :  { %v223_v12 = vadd.f32 %v222_v11, %v151_v10  ;;  %v1264_v10 = vld [vmem:[#allocation14 + $0x8] sm:$0x3f] }
 0x12d   :  { %v807_v13 = vpop.f32.mrf.mxu0  ;;  %v372_v11 = vrot.slane %v1264_v10, %v343_v58  ;;  %v650_v58 = vld [vmem:[#allocation13 + $0x10] sm:$0xff] }
 0x12e   :  { %v226_v14 = vsel %vm152_vm1, %v223_v12, 0.0 }
 0x12f   :  { %227 = vadd.xlane.f32.xlu0 %v226_v14 }
 0x1b8   :  { %v228_v15 = vpop.xlane.xlu0 %227 }
 0x1b9   :  { %v230_v16 = vmul.f32 0.03125, %v228_v15 }
 0x1bb   :  { %v231_v17 = vsub.f32 %v223_v12, %v230_v16  ;;  %v449_v12 = vrot.slane %v1214_v9, %v448_v6 }
 0x1bd   :  { %v232_v18 = vmul.f32 %v231_v17, %v231_v17 }
 0x1bf   :  { %v233_v19 = vsel %vm152_vm1, %v232_v18, 0.0 }
 0x1c0   :  { %234 = vadd.xlane.f32.xlu0 %v233_v19 }
 0x249   :  { %v235_v24 = vpop.xlane.xlu0 %234 }
 0x24a   :  { %v236_v25 = vmul.f32 0.03125, %v235_v24  ;;  %v364_v24 = vld [vmem:[#allocation10 + $0x38] sm:$0xff] }
 0x24c   :  { %v237_v26 = vadd.f32 1e-05, %v236_v25  ;;  %v363_v25 = vld [vmem:[#allocation10 + $0x30] sm:$0xff] }
 0x24e   :  { %892 = vrsqrt.f32 %v237_v26  ;;  %v362_v26 = vld [vmem:[#allocation10 + $0x28] sm:$0xff] }
 0x25b   :  { %v893_v30 = vpop.eup %892 }
 0x25c   :  { %v239_v31 = vmul.f32 %v893_v30, %v231_v17  ;;  %v360_v30 = vld [vmem:[#allocation10 + $0x18] sm:$0xff] }
 0x25e   :  { %v244_v33 = vmul.f32 %v243_v29, %v239_v31  ;;  %v361_v29 = vld [vmem:[#allocation10 + $0x20] sm:$0xff]  ;;  %v359_v31 = vld [vmem:[#allocation10 + $0x10] sm:$0xff] }
 0x260   :  { %v249_v34 = vadd.f32 %v248_v32, %v244_v33  ;;  %v358_v32 = vld [vmem:[#allocation10 + $0x8] sm:$0xff]  ;;  %v357_v33 = vld [vmem:[#allocation10] sm:$0xff] }
 0x262   :  { %v250_v35 = vmax.f32 %v249_v34, 0.0 }
 0x264   :  { %817 = vmatmul.mubr.msk.f32.vlgmr.msra.gmra.mxu1 %vm152_vm1, %v250_v35 }
 0x265   :  { %838 = vmatprep.mubr.msk.f32.mxu1 %vm1103_vm0, %v1102_v0  ;;  %831 = vmatpush3.msra.mxu1 %v356_v48 }
 0x266   :  { %832 = vmatprep.subr.mxu1 %v1102_v0 }
 0x267   :  { %833 = vmatpush3.msra.mxu1 %v355_v50 }
 0x268   :  { %834 = vmatprep.subr.mxu1 %v1102_v0 }
 0x269   :  { %835 = vmatpush3.msra.mxu1 %v354_v52 }
 0x26a   :  { %836 = vmatprep.subr.mxu1 %v1102_v0 }
 0x26b   :  { %837 = vmatpush3.msra.mxu1 %v353_v54  ;;  %v655_v54 = vld [vmem:[#allocation13 + $0x38] sm:$0xff] }
 0x26c   :  { %860 = vmatprep.subr.mxu1 %v1102_v0 }
 0x324   :  { %v324_v38 = vpop.f32.mrf.mxu1 }
 0x325   :  { %v325_v39 = vadd.f32 %v324_v38, %v254_v37  ;;  %v537_v38 = vsub.s32 7, %v1211_v7 }
 0x326   :  { %v818_v40 = vpop.f32.mrf.mxu1 }
 0x327   :  { %v328_v41 = vsel %vm152_vm1, %v325_v39, 0.0 }
 0x328   :  { %329 = vadd.xlane.f32.xlu1 %v328_v41  ;;  %v543_v41 = vrot.slane %v1264_v10, %v150_v8 }
 0x3b1   :  { %v330_v42 = vpop.xlane.xlu1 %329 }
 0x3b2   :  { %v331_v43 = vmul.f32 0.03125, %v330_v42 }
 0x3b4   :  { %v332_v44 = vsub.f32 %v325_v39, %v331_v43  ;;  %v538_v39 = vrot.slane %v1214_v9, %v537_v38 }
 0x3b6   :  { %v333_v45 = vmul.f32 %v332_v44, %v332_v44 }
 0x3b8   :  { %v334_v46 = vsel %vm152_vm1, %v333_v45, 0.0 }
 0x3b9   :  { %335 = vadd.xlane.f32.xlu1 %v334_v46  ;;  %v549_v46 = vrot.slane %v1264_v10, %v242_v27  ;;  %v653_v27 = vld [vmem:[#allocation13 + $0x28] sm:$0xff] }
 0x442   :  { %v336_v55 = vpop.xlane.xlu1 %335 }
 0x443   :  { %v337_v56 = vmul.f32 0.03125, %v336_v55  ;;  %v654_v55 = vld [vmem:[#allocation13 + $0x30] sm:$0xff] }
 0x445   :  { %v338_v57 = vadd.f32 1e-05, %v337_v56  ;;  %v652_v56 = vld [vmem:[#allocation13 + $0x20] sm:$0xff] }
 0x447   :  { %894 = vrsqrt.f32 %v338_v57  ;;  %v651_v57 = vld [vmem:[#allocation13 + $0x18] sm:$0xff] }
 0x454   :  { %v895_v61 = vpop.eup %894 }
 0x455   :  { %v340_v62 = vmul.f32 %v895_v61, %v332_v44  ;;  %v648_v61 = vld [vmem:[#allocation13] sm:$0xff] }
 0x457   :  { %v345_v1 = vmul.f32 %v344_v60, %v340_v62  ;;  %v649_v60 = vld [vmem:[#allocation13 + $0x8] sm:$0xff] }
 0x459   :  { %v350_v2 = vadd.f32 %v349_v63, %v345_v1 }
 0x45b   :  { %v351_v3 = vadd.f32 %v350_v2, %v1203_v5  ;;  %v639_v2 = vrot.slane %v1264_v10, %v247_v28 }
 0x45d   :  { %v352_v4 = vmax.f32 %v351_v3, 0.0 }
 0x45f   :  { %828 = vmatmul.mubr.msk.f32.vlgmr.msra.gmra.mxu0 %vm152_vm1, %v352_v4  ;;  %839 = vmatmul.mubr.msk.f32.vlgmr.msra.gmra.mxu1 %vm152_vm1, %v352_v4  ;;  %v644_v4 = vrot.slane %v1264_v10, %v253_v36 }
 0x460   :  { %857 = vmatprep.mubr.msk.f32.mxu0 %vm1103_vm0, %v1102_v0  ;;  %876 = vmatprep.mubr.msk.f32.mxu1 %vm1103_vm0, %v1102_v0 }
 0x461   :  { %842 = vmatpush3.msra.mxu0 %v364_v24  ;;  %861 = vmatpush3.msra.mxu1 %v655_v54 }
 0x462   :  { %843 = vmatprep.subr.mxu0 %v1102_v0  ;;  %862 = vmatprep.subr.mxu1 %v1102_v0 }
 0x463   :  { %844 = vmatpush3.msra.mxu0 %v363_v25  ;;  %863 = vmatpush3.msra.mxu1 %v654_v55 }
 0x464   :  { %845 = vmatprep.subr.mxu0 %v1102_v0  ;;  %864 = vmatprep.subr.mxu1 %v1102_v0 }
 0x465   :  { %846 = vmatpush3.msra.mxu0 %v362_v26  ;;  %865 = vmatpush3.msra.mxu1 %v653_v27 }
 0x466   :  { %847 = vmatprep.subr.mxu0 %v1102_v0  ;;  %866 = vmatprep.subr.mxu1 %v1102_v0 }
 0x467   :  { %848 = vmatpush3.msra.mxu0 %v361_v29  ;;  %867 = vmatpush3.msra.mxu1 %v652_v56 }
 0x468   :  { %849 = vmatprep.subr.mxu0 %v1102_v0  ;;  %868 = vmatprep.subr.mxu1 %v1102_v0 }
 0x469   :  { %850 = vmatpush3.msra.mxu0 %v360_v30  ;;  %869 = vmatpush3.msra.mxu1 %v651_v57 }
 0x46a   :  { %851 = vmatprep.subr.mxu0 %v1102_v0  ;;  %870 = vmatprep.subr.mxu1 %v1102_v0 }
 0x46b   :  { %852 = vmatpush3.msra.mxu0 %v359_v31  ;;  %871 = vmatpush3.msra.mxu1 %v650_v58 }
 0x46c   :  { %853 = vmatprep.subr.mxu0 %v1102_v0  ;;  %872 = vmatprep.subr.mxu1 %v1102_v0 }
 0x46d   :  { %854 = vmatpush3.msra.mxu0 %v358_v32  ;;  %873 = vmatpush3.msra.mxu1 %v649_v60 }
 0x46e   :  { %855 = vmatprep.subr.mxu0 %v1102_v0  ;;  %874 = vmatprep.subr.mxu1 %v1102_v0 }
 0x46f   :  { %856 = vmatpush3.msra.mxu0 %v357_v33  ;;  %875 = vmatpush3.msra.mxu1 %v648_v61 }
 0x51f   :  { %v442_v5 = vpop.f32.mrf.mxu0  ;;  %v516_v13 = vpop.f32.mrf.mxu1 }
 0x520   :  { %v1268_v14 = vadd.f32 %v442_v5, %v372_v11  ;;  %v517_v15 = vadd.f32 %v516_v13, %v449_v12  ;;  %v659_v13 = vrot.slane %v1264_v10, %v348_v59 }
 0x521   :  { %v829_v16 = vpop.f32.mrf.mxu0  ;;  %v840_v17 = vpop.f32.mrf.mxu1 }
 0x522   :  { %v521_v18 = vsel %vm520_vm2, %v517_v15, 0.0 }
 0x523   :  { %522 = vadd.xlane.f32.xlu0 %v521_v18 }
 0x5ac   :  { %v523_v19 = vpop.xlane.xlu0 %522 }
 0x5ad   :  { %v525_v20 = vmul.f32 0.015625, %v523_v19 }
 0x5af   :  { %v526_v21 = vsub.f32 %v517_v15, %v525_v20 }
 0x5b1   :  { %v527_v22 = vmul.f32 %v526_v21, %v526_v21 }
 0x5b3   :  { %v528_v23 = vsel %vm520_vm2, %v527_v22, 0.0 }
 0x5b4   :  { %529 = vadd.xlane.f32.xlu1 %v528_v23 }
 0x63d   :  { %v530_v34 = vpop.xlane.xlu1 %529 }
 0x63e   :  { %v531_v35 = vmul.f32 0.015625, %v530_v34 }
 0x640   :  { %v532_v37 = vadd.f32 1e-05, %v531_v35 }
 0x642   :  { %896 = vrsqrt.f32 %v532_v37 }
 0x64f   :  { %v897_v40 = vpop.eup %896 }
 0x650   :  { %v534_v42 = vmul.f32 %v897_v40, %v526_v21 }
 0x652   :  { %v539_v43 = vmul.f32 %v538_v39, %v534_v42 }
 0x654   :  { %v544_v44 = vadd.f32 %v543_v41, %v539_v43 }
 0x656   :  { %v545_v45 = vmax.f32 %v544_v44, 0.0 }
 0x658   :  { %858 = vmatmul.mubr.msk.f32.vlgmr.msra.gmra.mxu0 %vm520_vm2, %v545_v45 }
 0x718   :  { %v619_v47 = vpop.f32.mrf.mxu0 }
 0x719   :  { %v620_v48 = vadd.f32 %v619_v47, %v549_v46 }
 0x71a   :  { %v859_v49 = vpop.f32.mrf.mxu0 }
 0x71b   :  { %v623_v9 = vsel %vm520_vm2, %v620_v48, 0.0 }
 0x71c   :  { %624 = vadd.xlane.f32.xlu0 %v623_v9 }
 0x7a5   :  { %v625_v50 = vpop.xlane.xlu0 %624 }
 0x7a6   :  { %v626_v51 = vmul.f32 0.015625, %v625_v50 }
 0x7a8   :  { %v627_v52 = vsub.f32 %v620_v48, %v626_v51 }
 0x7aa   :  { %v628_v8 = vmul.f32 %v627_v52, %v627_v52 }
 0x7ac   :  { %v629_v53 = vsel %vm520_vm2, %v628_v8, 0.0 }
 0x7ad   :  { %630 = vadd.xlane.f32.xlu1 %v629_v53 }
 0x836   :  { %v631_v62 = vpop.xlane.xlu1 %630 }
 0x837   :  { %v632_v63 = vmul.f32 0.015625, %v631_v62 }
 0x839   :  { %v633_v1 = vadd.f32 1e-05, %v632_v63 }
 0x83b   :  { %898 = vrsqrt.f32 %v633_v1 }
 0x848   :  { %v899_v3 = vpop.eup %898 }
 0x849   :  { %v635_v6 = vmul.f32 %v899_v3, %v627_v52 }
 0x84b   :  { %v640_v11 = vmul.f32 %v639_v2, %v635_v6 }
 0x84d   :  { %v645_v12 = vadd.f32 %v644_v4, %v640_v11 }
 0x84f   :  { %v646_v5 = vadd.f32 %v645_v12, %v1268_v14 }
 0x851   :  { %v647_v0 = vmax.f32 %v646_v5, 0.0 }
 0x853   :  { %877 = vmatmul.mubr.msk.f32.vlgmr.msra.gmra.mxu1 %vm520_vm2, %v647_v0 }
 0x913   :  { %v729_v28 = vpop.f32.mrf.mxu1 }
 0x914   :  { %v730_v15 = vadd.f32 %v729_v28, %v659_v13 }
 0x915   :  { %v878_v16 = vpop.f32.mrf.mxu1 }
 0x916   :  { %733 = vst [vmem:[#allocation16] sm:$0xff] %v730_v15 }
 0x917   :  { %1071 = shalt.err (!%p1068_p2)
}
 0x918   :  { %743 = dma.vmem_to_hbm [thread:$0]  %s741_s7, 128, %s1319_s8, [#allocation4]  }
 0x919   :  { %1090 = dma.done.wait [#allocation4], 128  }
 0x91a   :  { %1091 = vsyncadd [#allocation4], 4294967168 }
 0x91b   :  { %747 = vsyncpa [#allocation3], 1 }
 0x91c   :  { %748 = vsyncpa [#allocation6], 1 }
 0x91d   :  { %749 = vsyncpa [#allocation9], 1 }
 0x91e   :  { %750 = vsyncpa [#allocation12], 1 }
 0x91f   :  { %751 = vsyncpa [#allocation15], 1 }
 0x920   :  { %752 = vsyncpa [#allocation4], 1 }

// kernel: tpu_custom_call.1
= control target key start
LH: loop header
LB: loop body
LE: loop exit
PB: predicated region body
PF: predicated region fallthrough
CT: control target
= control target key end

     0   :  { %13 = vsyncpa [#allocation3], 0  ;;  %s1311_s0 = inlined_call_operand.hbm [shape: f32[8,32], index: 0, kind: input, shape index: {}]   ;;  %s1312_s1 = inlined_call_operand.hbm [shape: f32[32,32], index: 1, kind: input, shape index: {}]   ;;  %s1313_s2 = inlined_call_operand.hbm [shape: f32[32,32], index: 2, kind: input, shape index: {}]   ;;  %s1314_s3 = inlined_call_operand.hbm [shape: f32[32,64], index: 3, kind: input, shape index: {}]   ;;  %s1315_s4 = inlined_call_operand.hbm [shape: f32[64,64], index: 4, kind: input, shape index: {}]   ;;  %s1316_s5 = inlined_call_operand.hbm [shape: f32[32,64], index: 5, kind: input, shape index: {}]   ;;  %s1317_s6 = inlined_call_operand.hbm [shape: f32[64,128], index: 6, kind: input, shape index: {}]   ;;  %s1318_s7 = inlined_call_operand.hbm [shape: f32[14,128], index: 7, kind: input, shape index: {}]   ;;  %s1319_s8 = inlined_call_operand.hbm [shape: f32[8,128], index: 8, kind: output, shape index: {}]  }
   0x1   :  { %14 = vsyncpa [#allocation6], 0 }
   0x2   :  { %15 = vsyncpa [#allocation9], 0 }
   0x3   :  { %16 = vsyncpa [#allocation12], 0 }
   0x4   :  { %17 = vsyncpa [#allocation15], 0 }
   0x5   :  { %18 = vsyncpa [#allocation4], 0  ;;  %s1092_s27 = smov [#allocation5]  }
   0x6   :  { %s34_s28 = sshll.u32 %s1092_s27, 4  ;;  %s35_s28 = int_to_ptr.vmem [resolvable:$true] %s34_s28 }
   0x7   :  { %s908_s29 = scalar_lea.vmem %s35_s28, 512  ;;  %p913_p1 = scmp.lt.s32.totalorder %s35_s28, %s35_s28 }
   0x8   :  { %p909_p0 = scmp.ne.s32.totalorder %s35_s28, %s908_s29  ;;  %p914_p2 = scmp.lt.s32.totalorder %s908_s29, %s908_s29 }
   0xa   :  { %p915_p3 = por %p914_p2, %p913_p1 }
   0xc   :  { %p916_p4 = pnand %p915_p3, %p909_p0 }
   0xe   :  { %919 = shalt.err (!%p916_p4)
}
   0xf   :  { %s1093_s30 = smov 128   ;;  %s1094_s9 = smov 8  }
  0x10   :  { %40 = dma.hbm_to_vmem [thread:$0]  %s1312_s1, 512, %s35_s28, [#allocation6], %s1093_s30, %s1093_s30, %s1094_s9  }
  0x11   :  { %s1095_s12 = smov [#allocation8]   ;;  %s1096_s14 = smov [#allocation11]  }
  0x12   :  { %s58_s13 = sshll.u32 %s1095_s12, 4  ;;  %s82_s15 = sshll.u32 %s1096_s14, 4  ;;  %s59_s13 = int_to_ptr.vmem [resolvable:$true] %s58_s13  ;;  %s83_s15 = int_to_ptr.vmem [resolvable:$true] %s82_s15 }
  0x13   :  { %s928_s16 = scalar_lea.vmem %s59_s13, 512  ;;  %p933_p6 = scmp.lt.s32.totalorder %s59_s13, %s59_s13 }
  0x14   :  { %p929_p5 = scmp.ne.s32.totalorder %s59_s13, %s928_s16  ;;  %p934_p7 = scmp.lt.s32.totalorder %s928_s16, %s928_s16 }
  0x16   :  { %p935_p8 = por %p934_p7, %p933_p6 }
  0x18   :  { %p936_p9 = pnand %p935_p8, %p929_p5 }
  0x1a   :  { %939 = shalt.err (!%p936_p9)
}
  0x1b   :  { %64 = dma.hbm_to_vmem [thread:$0]  %s1314_s3, 512, %s59_s13, [#allocation9], %s1093_s30, %s1093_s30, %s1094_s9  }
  0x1c   :  { %s948_s1 = scalar_lea.vmem %s83_s15, 512  ;;  %p953_p11 = scmp.lt.s32.totalorder %s83_s15, %s83_s15 }
  0x1d   :  { %p949_p10 = scmp.ne.s32.totalorder %s83_s15, %s948_s1  ;;  %p954_p12 = scmp.lt.s32.totalorder %s948_s1, %s948_s1 }
  0x1f   :  { %p955_p13 = por %p954_p12, %p953_p11 }
  0x21   :  { %p956_p0 = pnand %p955_p13, %p949_p10 }
  0x23   :  { %959 = shalt.err (!%p956_p0)
}
  0x24   :  { %88 = dma.hbm_to_vmem [thread:$0]  %s1316_s5, 512, %s83_s15, [#allocation12], %s1093_s30, %s1093_s30, %s1094_s9  }
  0x25   :  { %s1097_s21 = smov [#allocation2]   ;;  %s1098_s23 = smov [#allocation7]  }
  0x26   :  { %s25_s22 = sshll.u32 %s1097_s21, 4  ;;  %s46_s3 = sshll.u32 %s1098_s23, 4  ;;  %s26_s22 = int_to_ptr.vmem [resolvable:$true] %s25_s22  ;;  %s47_s3 = int_to_ptr.vmem [resolvable:$true] %s46_s3 }
  0x27   :  { %s968_s24 = scalar_lea.vmem %s26_s22, 128  ;;  %p973_p2 = scmp.lt.s32.totalorder %s26_s22, %s26_s22 }
  0x28   :  { %p969_p1 = scmp.ne.s32.totalorder %s26_s22, %s968_s24  ;;  %p974_p3 = scmp.lt.s32.totalorder %s968_s24, %s968_s24 }
  0x2a   :  { %p975_p4 = por %p974_p3, %p973_p2 }
  0x2c   :  { %p976_p5 = pnand %p975_p4, %p969_p1 }
  0x2e   :  { %979 = shalt.err (!%p976_p5)
}
  0x2f   :  { %28 = dma.hbm_to_vmem [thread:$0]  %s1311_s0, 128, %s26_s22, [#allocation3]  }
  0x30   :  { %s988_s27 = scalar_lea.vmem %s47_s3, 512  ;;  %p993_p7 = scmp.lt.s32.totalorder %s47_s3, %s47_s3 }
  0x31   :  { %p989_p6 = scmp.ne.s32.totalorder %s47_s3, %s988_s27  ;;  %p994_p8 = scmp.lt.s32.totalorder %s988_s27, %s988_s27 }
  0x33   :  { %p995_p9 = por %p994_p8, %p993_p7 }
  0x35   :  { %p996_p10 = pnand %p995_p9, %p989_p6 }
  0x37   :  { %999 = shalt.err (!%p996_p10)
}
  0x38   :  { %52 = dma.hbm_to_vmem [thread:$0]  %s1313_s2, 512, %s47_s3, [#allocation6], %s1093_s30, %s1093_s30, %s1094_s9  }
  0x39   :  { %s1099_s29 = smov [#allocation10]   ;;  %s1100_s11 = smov [#allocation13]  }
  0x3a   :  { %s70_s10 = sshll.u32 %s1099_s29, 4  ;;  %s94_s0 = sshll.u32 %s1100_s11, 4  ;;  %s71_s10 = int_to_ptr.vmem [resolvable:$true] %s70_s10  ;;  %s95_s0 = int_to_ptr.vmem [resolvable:$true] %s94_s0 }
  0x3b   :  { %s1008_s12 = scalar_lea.vmem %s71_s10, 1024  ;;  %p1013_p12 = scmp.lt.s32.totalorder %s71_s10, %s71_s10 }
  0x3c   :  { %p1009_p11 = scmp.ne.s32.totalorder %s71_s10, %s1008_s12  ;;  %p1014_p13 = scmp.lt.s32.totalorder %s1008_s12, %s1008_s12 }
  0x3e   :  { %p1015_p0 = por %p1014_p13, %p1013_p12 }
  0x40   :  { %p1016_p1 = pnand %p1015_p0, %p1009_p11 }
  0x42   :  { %1019 = shalt.err (!%p1016_p1)
}
  0x43   :  { %76 = dma.hbm_to_vmem [thread:$0]  %s1315_s4, 1024, %s71_s10, [#allocation9], %s1093_s30, %s1093_s30, %s1094_s9  }
  0x44   :  { %s1028_s2 = scalar_lea.vmem %s95_s0, 1024  ;;  %p1033_p3 = scmp.lt.s32.totalorder %s95_s0, %s95_s0 }
  0x45   :  { %p1029_p2 = scmp.ne.s32.totalorder %s95_s0, %s1028_s2  ;;  %p1034_p4 = scmp.lt.s32.totalorder %s1028_s2, %s1028_s2 }
  0x47   :  { %p1035_p5 = por %p1034_p4, %p1033_p3 }
  0x49   :  { %p1036_p6 = pnand %p1035_p5, %p1029_p2 }
  0x4b   :  { %1039 = shalt.err (!%p1036_p6)
}
  0x4c   :  { %100 = dma.hbm_to_vmem [thread:$0]  %s1317_s6, 1024, %s95_s0, [#allocation12], %s1093_s30, %s1093_s30, %s1094_s9  }
  0x4d   :  { %s1101_s17 = smov [#allocation14]  }
  0x4e   :  { %s106_s18 = sshll.u32 %s1101_s17, 4  ;;  %s107_s18 = int_to_ptr.vmem [resolvable:$true] %s106_s18 }
  0x4f   :  { %s1048_s1 = scalar_lea.vmem %s107_s18, 256  ;;  %p1053_p8 = scmp.lt.s32.totalorder %s107_s18, %s107_s18 }
  0x50   :  { %p1049_p7 = scmp.ne.s32.totalorder %s107_s18, %s1048_s1  ;;  %p1054_p9 = scmp.lt.s32.totalorder %s1048_s1, %s1048_s1 }
  0x52   :  { %p1055_p10 = por %p1054_p9, %p1053_p8 }
  0x54   :  { %p1056_p11 = pnand %p1055_p10, %p1049_p7 }
  0x56   :  { %1059 = shalt.err (!%p1056_p11)
}
  0x57   :  { %112 = dma.hbm_to_vmem [thread:$0]  %s1318_s7, 256, %s107_s18, [#allocation15], %s1093_s30, %s1093_s30, %s1094_s9  }
  0x58   :  { %1080 = dma.done.wait [#allocation3], 128  }
  0x59   :  { %1081 = vsyncadd [#allocation3], 4294967168 }
  0x5a   :  { %1082 = dma.done.wait [#allocation6], 1024  }
  0x5b   :  { %1083 = vsyncadd [#allocation6], 4294966272 }
  0x5c   :  { %1084 = dma.done.wait [#allocation9], 1536  }
  0x5d   :  { %1085 = vsyncadd [#allocation9], 4294965760 }
  0x5e   :  { %1086 = dma.done.wait [#allocation12], 1536  }
  0x5f   :  { %1087 = vsyncadd [#allocation12], 4294965760 }
  0x60   :  { %1088 = dma.done.wait [#allocation15], 256  }
  0x61   :  { %1089 = vsyncadd [#allocation15], 4294967040  ;;  %v1102_v0 = vmov 0.0   ;;  %vm1103_vm0 = vmmov 0   ;;  %v143_v1 = vld [vmem:[#allocation5 + $0x18] sm:$0xff]  ;;  %v142_v2 = vld [vmem:[#allocation5 + $0x10] sm:$0xff]  ;;  %v148_v6 = vlaneseq }
  0x62   :  { %797 = vmatprep.subr.mxu0 %v1102_v0  ;;  %805 = vmatprep.mubr.msk.f32.mxu0 %vm1103_vm0, %v1102_v0  ;;  %v141_v3 = vld [vmem:[#allocation5 + $0x8] sm:$0xff]  ;;  %v140_v4 = vld [vmem:[#allocation5] sm:$0xff]  ;;  %v1203_v5 = vld [vmem:[#allocation2] sm:$0xff]  ;;  %vm152_vm1 = vcmask 261120   ;;  %vm520_vm2 = vcmask 523264   ;;  %s1104_s6 = smov [#allocation16]  }
  0x63   :  { %808 = vmatprep.subr.mxu1 %v1102_v0  ;;  %816 = vmatprep.mubr.msk.f32.mxu1 %vm1103_vm0, %v1102_v0  ;;  %v1211_v7 = vshrl.u32 %v148_v6, 7  ;;  %v1214_v9 = vld [vmem:[#allocation14] sm:$0xff]  ;;  %v147_v20 = vld [vmem:[#allocation7 + $0x18] sm:$0xff]  ;;  %v146_v21 = vld [vmem:[#allocation7 + $0x10] sm:$0xff]  ;;  %s740_s7 = sshll.u32 %s1104_s6, 4  ;;  %s741_s7 = int_to_ptr.vmem [resolvable:$true] %s740_s7 }
  0x64   :  { %798 = vmatpush3.msra.mxu0 %v143_v1  ;;  %809 = vmatpush3.msra.mxu1 %v147_v20  ;;  %v145_v22 = vld [vmem:[#allocation7 + $0x8] sm:$0xff]  ;;  %v144_v23 = vld [vmem:[#allocation7] sm:$0xff]  ;;  %v368_v47 = vld [vmem:[#allocation11 + $0x18] sm:$0xff]  ;;  %s1060_s30 = scalar_lea.vmem %s741_s7, 128  ;;  %p1065_p13 = scmp.lt.s32.totalorder %s741_s7, %s741_s7 }
  0x65   :  { %799 = vmatprep.subr.mxu0 %v1102_v0  ;;  %v150_v8 = vsub.s32 0, %v1211_v7  ;;  %810 = vmatprep.subr.mxu1 %v1102_v0  ;;  %v242_v27 = vsub.s32 1, %v1211_v7  ;;  %v247_v28 = vsub.s32 2, %v1211_v7  ;;  %v253_v36 = vsub.s32 3, %v1211_v7  ;;  %v356_v48 = vld [vmem:[#allocation8 + $0x18] sm:$0xff]  ;;  %v367_v49 = vld [vmem:[#allocation11 + $0x10] sm:$0xff]  ;;  %p1061_p12 = scmp.ne.s32.totalorder %s741_s7, %s1060_s30  ;;  %p1066_p0 = scmp.lt.s32.totalorder %s1060_s30, %s1060_s30 }
  0x66   :  { %800 = vmatpush3.msra.mxu0 %v142_v2  ;;  %811 = vmatpush3.msra.mxu1 %v146_v21  ;;  %v355_v50 = vld [vmem:[#allocation8 + $0x10] sm:$0xff]  ;;  %v366_v51 = vld [vmem:[#allocation11 + $0x8] sm:$0xff]  ;;  %v365_v53 = vld [vmem:[#allocation11] sm:$0xff]  ;;  %v343_v58 = vsub.s32 4, %v1211_v7  ;;  %v348_v59 = vsub.s32 5, %v1211_v7  ;;  %v448_v6 = vsub.s32 6, %v1211_v7 }
  0x67   :  { %801 = vmatprep.subr.mxu0 %v1102_v0  ;;  %v151_v10 = vrot.slane %v1214_v9, %v150_v8  ;;  %812 = vmatprep.subr.mxu1 %v1102_v0  ;;  %v243_v29 = vrot.slane %v1214_v9, %v242_v27  ;;  %v248_v32 = vrot.slane %v1214_v9, %v247_v28  ;;  %v354_v52 = vld [vmem:[#allocation8 + $0x8] sm:$0xff]  ;;  %v353_v54 = vld [vmem:[#allocation8] sm:$0xff]  ;;  %p1067_p1 = por %p1066_p0, %p1065_p13 }
  0x68   :  { %802 = vmatpush3.msra.mxu0 %v141_v3  ;;  %813 = vmatpush3.msra.mxu1 %v145_v22  ;;  %v254_v37 = vrot.slane %v1214_v9, %v253_v36  ;;  %v344_v60 = vrot.slane %v1214_v9, %v343_v58  ;;  %v349_v63 = vrot.slane %v1214_v9, %v348_v59 }
  0x69   :  { %803 = vmatprep.subr.mxu0 %v1102_v0  ;;  %814 = vmatprep.subr.mxu1 %v1102_v0  ;;  %p1068_p2 = pnand %p1067_p1, %p1061_p12 }
  0x6a   :  { %804 = vmatpush3.msra.mxu0 %v140_v4  ;;  %815 = vmatpush3.msra.mxu1 %v144_v23 }
  0x6b   :  { %806 = vmatmul.mubr.msk.f32.vlgmr.msra.gmra.mxu0 %vm152_vm1, %v1203_v5  ;;  %819 = vmatprep.subr.mxu0 %v1102_v0 }
  0x6c   :  { %827 = vmatprep.mubr.msk.f32.mxu0 %vm1103_vm0, %v1102_v0  ;;  %830 = vmatprep.subr.mxu1 %v1102_v0 }
  0x6d   :  { %820 = vmatpush3.msra.mxu0 %v368_v47 }
  0x6e   :  { %821 = vmatprep.subr.mxu0 %v1102_v0 }
  0x6f   :  { %822 = vmatpush3.msra.mxu0 %v367_v49 }
  0x70   :  { %823 = vmatprep.subr.mxu0 %v1102_v0 }
  0x71   :  { %824 = vmatpush3.msra.mxu0 %v366_v51 }
  0x72   :  { %825 = vmatprep.subr.mxu0 %v1102_v0 }
  0x73   :  { %826 = vmatpush3.msra.mxu0 %v365_v53 }
  0x74   :  { %841 = vmatprep.subr.mxu0 %v1102_v0 }
 0x12b   :  { %v222_v11 = vpop.f32.mrf.mxu0 }
 0x12c   :  { %v223_v12 = vadd.f32 %v222_v11, %v151_v10  ;;  %v1264_v10 = vld [vmem:[#allocation14 + $0x8] sm:$0x3f] }
 0x12d   :  { %v807_v13 = vpop.f32.mrf.mxu0  ;;  %v372_v11 = vrot.slane %v1264_v10, %v343_v58  ;;  %v650_v58 = vld [vmem:[#allocation13 + $0x10] sm:$0xff] }
 0x12e   :  { %v226_v14 = vsel %vm152_vm1, %v223_v12, 0.0 }
 0x12f   :  { %227 = vadd.xlane.f32.xlu0 %v226_v14 }
 0x1b8   :  { %v228_v15 = vpop.xlane.xlu0 %227 }
 0x1b9   :  { %v230_v16 = vmul.f32 0.03125, %v228_v15 }
 0x1bb   :  { %v231_v17 = vsub.f32 %v223_v12, %v230_v16  ;;  %v449_v12 = vrot.slane %v1214_v9, %v448_v6 }
 0x1bd   :  { %v232_v18 = vmul.f32 %v231_v17, %v231_v17 }
 0x1bf   :  { %v233_v19 = vsel %vm152_vm1, %v232_v18, 0.0 }
 0x1c0   :  { %234 = vadd.xlane.f32.xlu0 %v233_v19 }
 0x249   :  { %v235_v24 = vpop.xlane.xlu0 %234 }
 0x24a   :  { %v236_v25 = vmul.f32 0.03125, %v235_v24  ;;  %v364_v24 = vld [vmem:[#allocation10 + $0x38] sm:$0xff] }
 0x24c   :  { %v237_v26 = vadd.f32 1e-05, %v236_v25  ;;  %v363_v25 = vld [vmem:[#allocation10 + $0x30] sm:$0xff] }
 0x24e   :  { %892 = vrsqrt.f32 %v237_v26  ;;  %v362_v26 = vld [vmem:[#allocation10 + $0x28] sm:$0xff] }
 0x25b   :  { %v893_v30 = vpop.eup %892 }
 0x25c   :  { %v239_v31 = vmul.f32 %v893_v30, %v231_v17  ;;  %v360_v30 = vld [vmem:[#allocation10 + $0x18] sm:$0xff] }
 0x25e   :  { %v244_v33 = vmul.f32 %v243_v29, %v239_v31  ;;  %v361_v29 = vld [vmem:[#allocation10 + $0x20] sm:$0xff]  ;;  %v359_v31 = vld [vmem:[#allocation10 + $0x10] sm:$0xff] }
 0x260   :  { %v249_v34 = vadd.f32 %v248_v32, %v244_v33  ;;  %v358_v32 = vld [vmem:[#allocation10 + $0x8] sm:$0xff]  ;;  %v357_v33 = vld [vmem:[#allocation10] sm:$0xff] }
 0x262   :  { %v250_v35 = vmax.f32 %v249_v34, 0.0 }
 0x264   :  { %817 = vmatmul.mubr.msk.f32.vlgmr.msra.gmra.mxu1 %vm152_vm1, %v250_v35 }
 0x265   :  { %838 = vmatprep.mubr.msk.f32.mxu1 %vm1103_vm0, %v1102_v0  ;;  %831 = vmatpush3.msra.mxu1 %v356_v48 }
 0x266   :  { %832 = vmatprep.subr.mxu1 %v1102_v0 }
 0x267   :  { %833 = vmatpush3.msra.mxu1 %v355_v50 }
 0x268   :  { %834 = vmatprep.subr.mxu1 %v1102_v0 }
 0x269   :  { %835 = vmatpush3.msra.mxu1 %v354_v52 }
 0x26a   :  { %836 = vmatprep.subr.mxu1 %v1102_v0 }
 0x26b   :  { %837 = vmatpush3.msra.mxu1 %v353_v54  ;;  %v655_v54 = vld [vmem:[#allocation13 + $0x38] sm:$0xff] }
 0x26c   :  { %860 = vmatprep.subr.mxu1 %v1102_v0 }
 0x324   :  { %v324_v38 = vpop.f32.mrf.mxu1 }
 0x325   :  { %v325_v39 = vadd.f32 %v324_v38, %v254_v37  ;;  %v537_v38 = vsub.s32 7, %v1211_v7 }
 0x326   :  { %v818_v40 = vpop.f32.mrf.mxu1 }
 0x327   :  { %v328_v41 = vsel %vm152_vm1, %v325_v39, 0.0 }
 0x328   :  { %329 = vadd.xlane.f32.xlu1 %v328_v41  ;;  %v543_v41 = vrot.slane %v1264_v10, %v150_v8 }
 0x3b1   :  { %v330_v42 = vpop.xlane.xlu1 %329 }
 0x3b2   :  { %v331_v43 = vmul.f32 0.03125, %v330_v42 }
 0x3b4   :  { %v332_v44 = vsub.f32 %v325_v39, %v331_v43  ;;  %v538_v39 = vrot.slane %v1214_v9, %v537_v38 }
 0x3b6   :  { %v333_v45 = vmul.f32 %v332_v44, %v332_v44 }
 0x3b8   :  { %v334_v46 = vsel %vm152_vm1, %v333_v45, 0.0 }
 0x3b9   :  { %335 = vadd.xlane.f32.xlu1 %v334_v46  ;;  %v549_v46 = vrot.slane %v1264_v10, %v242_v27  ;;  %v653_v27 = vld [vmem:[#allocation13 + $0x28] sm:$0xff] }
 0x442   :  { %v336_v55 = vpop.xlane.xlu1 %335 }
 0x443   :  { %v337_v56 = vmul.f32 0.03125, %v336_v55  ;;  %v654_v55 = vld [vmem:[#allocation13 + $0x30] sm:$0xff] }
 0x445   :  { %v338_v57 = vadd.f32 1e-05, %v337_v56  ;;  %v652_v56 = vld [vmem:[#allocation13 + $0x20] sm:$0xff] }
 0x447   :  { %894 = vrsqrt.f32 %v338_v57  ;;  %v651_v57 = vld [vmem:[#allocation13 + $0x18] sm:$0xff] }
 0x454   :  { %v895_v61 = vpop.eup %894 }
 0x455   :  { %v340_v62 = vmul.f32 %v895_v61, %v332_v44  ;;  %v648_v61 = vld [vmem:[#allocation13] sm:$0xff] }
 0x457   :  { %v345_v1 = vmul.f32 %v344_v60, %v340_v62  ;;  %v649_v60 = vld [vmem:[#allocation13 + $0x8] sm:$0xff] }
 0x459   :  { %v350_v2 = vadd.f32 %v349_v63, %v345_v1 }
 0x45b   :  { %v351_v3 = vadd.f32 %v350_v2, %v1203_v5  ;;  %v639_v2 = vrot.slane %v1264_v10, %v247_v28 }
 0x45d   :  { %v352_v4 = vmax.f32 %v351_v3, 0.0 }
 0x45f   :  { %828 = vmatmul.mubr.msk.f32.vlgmr.msra.gmra.mxu0 %vm152_vm1, %v352_v4  ;;  %839 = vmatmul.mubr.msk.f32.vlgmr.msra.gmra.mxu1 %vm152_vm1, %v352_v4  ;;  %v644_v4 = vrot.slane %v1264_v10, %v253_v36 }
 0x460   :  { %857 = vmatprep.mubr.msk.f32.mxu0 %vm1103_vm0, %v1102_v0  ;;  %876 = vmatprep.mubr.msk.f32.mxu1 %vm1103_vm0, %v1102_v0 }
 0x461   :  { %842 = vmatpush3.msra.mxu0 %v364_v24  ;;  %861 = vmatpush3.msra.mxu1 %v655_v54 }
 0x462   :  { %843 = vmatprep.subr.mxu0 %v1102_v0  ;;  %862 = vmatprep.subr.mxu1 %v1102_v0 }
 0x463   :  { %844 = vmatpush3.msra.mxu0 %v363_v25  ;;  %863 = vmatpush3.msra.mxu1 %v654_v55 }
 0x464   :  { %845 = vmatprep.subr.mxu0 %v1102_v0  ;;  %864 = vmatprep.subr.mxu1 %v1102_v0 }
 0x465   :  { %846 = vmatpush3.msra.mxu0 %v362_v26  ;;  %865 = vmatpush3.msra.mxu1 %v653_v27 }
 0x466   :  { %847 = vmatprep.subr.mxu0 %v1102_v0  ;;  %866 = vmatprep.subr.mxu1 %v1102_v0 }
 0x467   :  { %848 = vmatpush3.msra.mxu0 %v361_v29  ;;  %867 = vmatpush3.msra.mxu1 %v652_v56 }
 0x468   :  { %849 = vmatprep.subr.mxu0 %v1102_v0  ;;  %868 = vmatprep.subr.mxu1 %v1102_v0 }
 0x469   :  { %850 = vmatpush3.msra.mxu0 %v360_v30  ;;  %869 = vmatpush3.msra.mxu1 %v651_v57 }
 0x46a   :  { %851 = vmatprep.subr.mxu0 %v1102_v0  ;;  %870 = vmatprep.subr.mxu1 %v1102_v0 }
 0x46b   :  { %852 = vmatpush3.msra.mxu0 %v359_v31  ;;  %871 = vmatpush3.msra.mxu1 %v650_v58 }
 0x46c   :  { %853 = vmatprep.subr.mxu0 %v1102_v0  ;;  %872 = vmatprep.subr.mxu1 %v1102_v0 }
 0x46d   :  { %854 = vmatpush3.msra.mxu0 %v358_v32  ;;  %873 = vmatpush3.msra.mxu1 %v649_v60 }
 0x46e   :  { %855 = vmatprep.subr.mxu0 %v1102_v0  ;;  %874 = vmatprep.subr.mxu1 %v1102_v0 }
 0x46f   :  { %856 = vmatpush3.msra.mxu0 %v357_v33  ;;  %875 = vmatpush3.msra.mxu1 %v648_v61 }
 0x51f   :  { %v442_v5 = vpop.f32.mrf.mxu0  ;;  %v516_v13 = vpop.f32.mrf.mxu1 }
 0x520   :  { %v1268_v14 = vadd.f32 %v442_v5, %v372_v11  ;;  %v517_v15 = vadd.f32 %v516_v13, %v449_v12  ;;  %v659_v13 = vrot.slane %v1264_v10, %v348_v59 }
 0x521   :  { %v829_v16 = vpop.f32.mrf.mxu0  ;;  %v840_v17 = vpop.f32.mrf.mxu1 }
 0x522   :  { %v521_v18 = vsel %vm520_vm2, %v517_v15, 0.0 }
 0x523   :  { %522 = vadd.xlane.f32.xlu0 %v521_v18 }
 0x5ac   :  { %v523_v19 = vpop.xlane.xlu0 %522 }
 0x5ad   :  { %v525_v20 = vmul.f32 0.015625, %v523_v19 }
 0x5af   :  { %v526_v21 = vsub.f32 %v517_v15, %v525_v20 }
 0x5b1   :  { %v527_v22 = vmul.f32 %v526_v21, %v526_v21 }
 0x5b3   :  { %v528_v23 = vsel %vm520_vm2, %v527_v22, 0.0 }
 0x5b4   :  { %529 = vadd.xlane.f32.xlu1 %v528_v23 }
 0x63d   :  { %v530_v34 = vpop.xlane.xlu1 %529 }
 0x63e   :  { %v531_v35 = vmul.f32 0.015625, %v530_v34 }
 0x640   :  { %v532_v37 = vadd.f32 1e-05, %v531_v35 }
 0x642   :  { %896 = vrsqrt.f32 %v532_v37 }
 0x64f   :  { %v897_v40 = vpop.eup %896 }
 0x650   :  { %v534_v42 = vmul.f32 %v897_v40, %v526_v21 }
 0x652   :  { %v539_v43 = vmul.f32 %v538_v39, %v534_v42 }
 0x654   :  { %v544_v44 = vadd.f32 %v543_v41, %v539_v43 }
 0x656   :  { %v545_v45 = vmax.f32 %v544_v44, 0.0 }
 0x658   :  { %858 = vmatmul.mubr.msk.f32.vlgmr.msra.gmra.mxu0 %vm520_vm2, %v545_v45 }
 0x718   :  { %v619_v47 = vpop.f32.mrf.mxu0 }
 0x719   :  { %v620_v48 = vadd.f32 %v619_v47, %v549_v46 }
 0x71a   :  { %v859_v49 = vpop.f32.mrf.mxu0 }
 0x71b   :  { %v623_v9 = vsel %vm520_vm2, %v620_v48, 0.0 }
 0x71c   :  { %624 = vadd.xlane.f32.xlu0 %v623_v9 }
 0x7a5   :  { %v625_v50 = vpop.xlane.xlu0 %624 }
 0x7a6   :  { %v626_v51 = vmul.f32 0.015625, %v625_v50 }
 0x7a8   :  { %v627_v52 = vsub.f32 %v620_v48, %v626_v51 }
 0x7aa   :  { %v628_v8 = vmul.f32 %v627_v52, %v627_v52 }
 0x7ac   :  { %v629_v53 = vsel %vm520_vm2, %v628_v8, 0.0 }
 0x7ad   :  { %630 = vadd.xlane.f32.xlu1 %v629_v53 }
 0x836   :  { %v631_v62 = vpop.xlane.xlu1 %630 }
 0x837   :  { %v632_v63 = vmul.f32 0.015625, %v631_v62 }
 0x839   :  { %v633_v1 = vadd.f32 1e-05, %v632_v63 }
 0x83b   :  { %898 = vrsqrt.f32 %v633_v1 }
 0x848   :  { %v899_v3 = vpop.eup %898 }
 0x849   :  { %v635_v6 = vmul.f32 %v899_v3, %v627_v52 }
 0x84b   :  { %v640_v11 = vmul.f32 %v639_v2, %v635_v6 }
 0x84d   :  { %v645_v12 = vadd.f32 %v644_v4, %v640_v11 }
 0x84f   :  { %v646_v5 = vadd.f32 %v645_v12, %v1268_v14 }
 0x851   :  { %v647_v0 = vmax.f32 %v646_v5, 0.0 }
 0x853   :  { %877 = vmatmul.mubr.msk.f32.vlgmr.msra.gmra.mxu1 %vm520_vm2, %v647_v0 }
 0x913   :  { %v729_v28 = vpop.f32.mrf.mxu1 }
 0x914   :  { %v730_v15 = vadd.f32 %v729_v28, %v659_v13 }
 0x915   :  { %v878_v16 = vpop.f32.mrf.mxu1 }
 0x916   :  { %733 = vst [vmem:[#allocation16] sm:$0xff] %v730_v15 }
 0x917   :  { %1071 = shalt.err (!%p1068_p2)
}
 0x918   :  { %743 = dma.vmem_to_hbm [thread:$0]  %s741_s7, 128, %s1319_s8, [#allocation4]  }
 0x919   :  { %1090 = dma.done.wait [#allocation4], 128  }
 0x91a   :  { %1091 = vsyncadd [#allocation4], 4294967168 }
 0x91b   :  { %747 = vsyncpa [#allocation3], 1 }
 0x91c   :  { %748 = vsyncpa [#allocation6], 1 }
 0x91d   :  { %749 = vsyncpa [#allocation9], 1 }
 0x91e   :  { %750 = vsyncpa [#allocation12], 1 }
 0x91f   :  { %751 = vsyncpa [#allocation15], 1 }
 0x920   :  { %752 = vsyncpa [#allocation4], 1 }

</bundles_post_ra>
